<compile_context>
chip_gen: v5e
topology: v5e:2x2
jax: 0.10.0
libtpu: 0.0.40
codegen_flags: <defaults>
</compile_context>

<pallas_src>
import functools

import jax
import jax.numpy as jnp
from jax.experimental import pallas as pl
from jax.experimental.pallas import tpu as pltpu

_F32 = jnp.float32
# Set to jnp.bfloat16 on v6e/v7x for higher MXU throughput and half the weight DMA/VMEM.
MATMUL_DTYPE = jnp.float32


def _round_up(x, m):
    return ((x + m - 1) // m) * m


def _dot(a, b):
    return jnp.dot(a.astype(MATMUL_DTYPE), b, preferred_element_type=jnp.float32)


# --------------------------------------------------------------------------------------
# In-kernel building blocks
# --------------------------------------------------------------------------------------

def _layernorm(x, g, b):
    mu = jnp.mean(x, axis=-1, keepdims=True)
    xc = x - mu
    var = jnp.mean(xc * xc, axis=-1, keepdims=True)
    return xc * jax.lax.rsqrt(var + 1e-5) * g + b


def _resblock(x, w1, w23, v, din, dh, dout):
    """LayerNorm( relu(x@W1+b1)@W2 + x@W3 + (b2+b3) ); dropout = identity (eval mode).

    w23 = [W2; W3] row-stacked; v = [b1; b2+b3; gamma; beta] width-padded to max(dh, dout).
    """
    h = jnp.maximum(_dot(x, w1) + v[0:1, :dh], 0.0)
    out = _dot(h, w23[0:dh, :]) + _dot(x, w23[dh:dh + din, :]) + v[1:2, :dout]
    return _layernorm(out, v[2:3, :dout], v[3:4, :dout])


# --------------------------------------------------------------------------------------
# Kernel 1: feature-encoder ResBlock over all B*(seq_len+pred_len) time-mark rows
# --------------------------------------------------------------------------------------

def _fe_kernel(x_ref, w1_ref, w23_ref, v_ref, o_ref, *, din, dh, dout):
    o_ref[...] = _resblock(x_ref[...], w1_ref[...], w23_ref[...], v_ref[...], din, dh, dout)


def feature_encode(x, blk):
    """[M, feature_dim] -> [M, feature_encode_dim], row-gridded and pipelined."""
    m, din = x.shape
    dh = blk["W1"].shape[1]
    dout = blk["W23"].shape[1]

    bm = min(512, _round_up(m, 8))
    m_pad = _round_up(m, bm)
    if m_pad != m:
        x = jnp.pad(x, ((0, m_pad - m), (0, 0)))

    const2 = lambda i: (0, 0)
    out = pl.pallas_call(
        functools.partial(_fe_kernel, din=din, dh=dh, dout=dout),
        out_shape=jax.ShapeDtypeStruct((m_pad, dout), jnp.float32),
        grid=(m_pad // bm,),
        in_specs=[pl.BlockSpec((bm, din), lambda i: (i, 0)),
                  pl.BlockSpec(blk["W1"].shape, const2),
                  pl.BlockSpec(blk["W23"].shape, const2),
                  pl.BlockSpec(blk["V"].shape, const2)],
        out_specs=pl.BlockSpec((bm, dout), lambda i: (i, 0)),
        compiler_params=pltpu.CompilerParams(
            dimension_semantics=("parallel",),
            vmem_limit_bytes=64 * 1024 * 1024),
    )(x, blk["W1"], blk["W23"], blk["V"])
    return out[:m]


# --------------------------------------------------------------------------------------
# Kernel 2: fully fused per-(batch, series-block) TiDE pipeline
# --------------------------------------------------------------------------------------

def _tide_fused_kernel(x_ref, feat_ref, ffut_ref,
                       e0_wx_ref, e0_wf_ref, e0_w2_ref, e0_wx3_ref, e0_v_ref, e0_br_ref,
                       er_w1_ref, er_w23_ref, er_v_ref,
                       dr_w1_ref, dr_w23_ref, dr_v_ref,
                       dl_w1_ref, dl_w23_ref, dl_v_ref,
                       tdd_w1_ref, td_w2_ref, tdd_w3_ref, tdf_w13_ref, td_v_ref,
                       o_ref, *,
                       pred_len, hid, decdim, dff, e_layers, d_layers):
    p_dff = pred_len * dff
    x = x_ref[0]            # [bn, seq_len]  (one series-block of one batch element)
    feat = feat_ref[0]      # [1, (seq_len+pred_len)*fed]   shared per batch
    ffut = ffut_ref[0]      # [1, pred_len*fed]             shared per batch

    # ---- instance normalization over the time axis (RevIN without affine) ----
    mean = jnp.mean(x, axis=-1, keepdims=True)
    xc = x - mean
    var = jnp.mean(xc * xc, axis=-1, keepdims=True)        # unbiased=False
    std = jnp.sqrt(var + 1e-5)                              # kept for de-normalization
    x_norm = xc * jax.lax.rsqrt(var + 1e-5)                 # EUP rsqrt instead of divide

    # ---- encoder block 0 on concat([x_norm, feat]):
    #      x_norm is multiplied once with [W1_x || Wr] (residual proj fused into the dot);
    #      feat contributions are per-batch [1, hid] vectors shared by all series. ----
    xa = _dot(x_norm, e0_wx_ref[...])                       # [bn, hid + pred_len]
    fa = _dot(feat, e0_wf_ref[...])                         # [1, 2*hid] = [f@W1_f || f@W3_f]
    e0_v = e0_v_ref[...]
    h = jnp.maximum(xa[:, :hid] + fa[:, :hid] + e0_v[0:1, :], 0.0)
    out = (_dot(h, e0_w2_ref[...]) + _dot(x_norm, e0_wx3_ref[...])
           + fa[:, hid:] + e0_v[1:2, :])
    hidden = _layernorm(out, e0_v[2:3, :], e0_v[3:4, :])
    res = xa[:, hid:] + e0_br_ref[...]                      # residual projection [bn, pred_len]

    # ---- weight-shared encoder / decoder ResBlocks (invariant reads hoisted, unrolled) ----
    er_w1, er_w23, er_v = er_w1_ref[...], er_w23_ref[...], er_v_ref[...]
    hidden = jax.lax.fori_loop(
        0, e_layers - 1,
        lambda _, hcur: _resblock(hcur, er_w1, er_w23, er_v, hid, hid, hid),
        hidden, unroll=True)
    dr_w1, dr_w23, dr_v = dr_w1_ref[...], dr_w23_ref[...], dr_v_ref[...]
    hidden = jax.lax.fori_loop(
        0, d_layers - 1,
        lambda _, hcur: _resblock(hcur, dr_w1, dr_w23, dr_v, hid, hid, hid),
        hidden, unroll=True)
    decoded = _resblock(hidden, dl_w1_ref[...], dl_w23_ref[...], dl_v_ref[...],
                        hid, hid, decdim * pred_len)        # [bn, pred_len*decdim]

    # ---- temporal decoder: all pred_len steps batched via block-diagonal weights ----
    td_v = td_v_ref[...]
    fcon = _dot(ffut, tdf_w13_ref[...])                     # [1, p_dff + pred_len] (per batch)
    h_td = jnp.maximum(_dot(decoded, tdd_w1_ref[...]) + fcon[:, :p_dff] + td_v[0:1, :], 0.0)
    z = (_dot(h_td, td_w2_ref[...]) + _dot(decoded, tdd_w3_ref[...])
         + fcon[:, p_dff:] + td_v[1:2, :pred_len])          # [bn, pred_len]
    # nn.LayerNorm(1): every element is its own normalization group -> normalized value is
    # exactly 0 and the result equals the LayerNorm bias (kept in its general form).
    zc = z - z
    td = zc * jax.lax.rsqrt(zc * zc + 1e-5) * td_v[2:3, :pred_len] + td_v[3:4, :pred_len]

    # ---- residual add + de-normalization ----
    o_ref[0] = (td + res) * std + mean


def tide_fused(x_series, feat_flat, feat_fut, params, cfg):
    pred_len = cfg["pred_len"]
    hid, decdim, dff = cfg["d_model"], cfg["c_out"], cfg["d_ff"]
    seq_len = cfg["seq_len"]

    B, N, _ = x_series.shape
    t_fed = feat_flat.shape[-1]
    p_fed = feat_fut.shape[-1]

    # Series-block size: <=256 rows per step (sweep 256-512 on v5e/v6e); ensures the
    # (8, 128)-or-full constraint on every block and >=2 grid steps for megacore sharding.
    n8 = _round_up(N, 8)
    if n8 <= 256:
        bn, n_pad = n8, n8
    else:
        bn, n_pad = 256, _round_up(N, 256)
    if n_pad != N:
        x_series = jnp.pad(x_series, ((0, 0), (0, n_pad - N), (0, 0)))
    grid = (B, n_pad // bn)

    kernel = functools.partial(
        _tide_fused_kernel,
        pred_len=pred_len, hid=hid, decdim=decdim, dff=dff,
        e_layers=cfg["e_layers"], d_layers=cfg["d_layers"])

    def wspec(a):
        # Full-array weight block, constant index map: DMA'd once, resident across the grid.
        # (On v7x with realistic d_model/pred_len: add pipeline_mode=pl.Buffered(1) here and
        #  tile dec_last's output dim to stay under the 64 MiB VMEM budget.)
        return pl.BlockSpec(a.shape, lambda b, n: (0, 0))

    p = params
    w_args = [p["e0_wx"], p["e0_wf"], p["e0_w2"], p["e0_wx3"], p["e0_v"], p["e0_br"],
              p["enc_rep"]["W1"], p["enc_rep"]["W23"], p["enc_rep"]["V"],
              p["dec_rep"]["W1"], p["dec_rep"]["W23"], p["dec_rep"]["V"],
              p["dec_last"]["W1"], p["dec_last"]["W23"], p["dec_last"]["V"],
              p["td_d_w1"], p["td_w2"], p["td_d_w3"], p["td_f_w13"], p["td_v"]]

    in_specs = ([pl.BlockSpec((1, bn, seq_len), lambda b, n: (b, n, 0)),
                 # feature slabs depend only on the batch axis -> fetched once per batch,
                 # never repeated N times in HBM or over the DMA path.
                 pl.BlockSpec((1, 1, t_fed), lambda b, n: (b, 0, 0)),
                 pl.BlockSpec((1, 1, p_fed), lambda b, n: (b, 0, 0))]
                + [wspec(a) for a in w_args])

    out = pl.pallas_call(
        kernel,
        out_shape=jax.ShapeDtypeStruct((B, n_pad, pred_len), jnp.float32),
        grid=grid,
        in_specs=in_specs,
        out_specs=pl.BlockSpec((1, bn, pred_len), lambda b, n: (b, n, 0)),
        compiler_params=pltpu.CompilerParams(
            dimension_semantics=("parallel", "parallel"),
            vmem_limit_bytes=64 * 1024 * 1024),
    )(x_series, feat_flat, feat_fut, *w_args)
    return out[:, :N, :]


# --------------------------------------------------------------------------------------
# Deterministic parameter construction (mirrors TiDE.__init__ shapes) + packing
# --------------------------------------------------------------------------------------

def _init_linear(key, din, dout, scale=0.1):
    kw, kb = jax.random.split(key)
    w = jax.random.normal(kw, (din, dout), _F32) * scale
    b = jax.random.normal(kb, (1, dout), _F32) * scale
    return w, b


def _init_resblock_raw(key, din, dh, dout):
    k1, k2, k3 = jax.random.split(key, 3)
    w1, b1 = _init_linear(k1, din, dh)
    w2, b2 = _init_linear(k2, dh, dout)
    w3, b3 = _init_linear(k3, din, dout)
    return dict(W1=w1, b1=b1, W2=w2, b2=b2, W3=w3, b3=b3,
                g=jnp.ones((1, dout), _F32),        # LayerNorm weight = ones
                beta=jnp.zeros((1, dout), _F32))    # LayerNorm bias  = zeros


def _pack_resblock(raw):
    din, dh = raw["W1"].shape
    dout = raw["W2"].shape[1]
    w = max(dh, dout)
    pad = lambda v: jnp.pad(v, ((0, 0), (0, w - v.shape[1])))
    vecs = jnp.concatenate([pad(raw["b1"]), pad(raw["b2"] + raw["b3"]),   # bias fold
                            pad(raw["g"]), pad(raw["beta"])], axis=0)      # [4, max(dh,dout)]
    return dict(W1=raw["W1"].astype(MATMUL_DTYPE),
                W23=jnp.concatenate([raw["W2"], raw["W3"]], axis=0).astype(MATMUL_DTYPE),
                V=vecs)


def _pack_enc0(raw, wr, br, seq_len):
    return {
        # x_norm multiplied once with [W1_x || Wr] (residual projection fused in).
        "e0_wx":  jnp.concatenate([raw["W1"][:seq_len], wr], axis=1).astype(MATMUL_DTYPE),
        # feat multiplied once with [W1_f || W3_f] (shared [1, 2*hid] per-batch contribution).
        "e0_wf":  jnp.concatenate([raw["W1"][seq_len:], raw["W3"][seq_len:]],
                                  axis=1).astype(MATMUL_DTYPE),
        "e0_w2":  raw["W2"].astype(MATMUL_DTYPE),
        "e0_wx3": raw["W3"][:seq_len].astype(MATMUL_DTYPE),
        "e0_v":   jnp.concatenate([raw["b1"], raw["b2"] + raw["b3"],
                                   raw["g"], raw["beta"]], axis=0),         # [4, hid]
        "e0_br":  br,                                                        # [1, pred_len]
    }


def _pack_temporal(raw, pred_len, fed, dff):
    # Block-diagonal (kron with I_pred) weights: all pred_len temporal-decoder steps become
    # 3 dots; feat/decoded keep their natural flattened layouts (no in-kernel lane slicing).
    eye = jnp.eye(pred_len, dtype=_F32)
    p_dff = pred_len * dff
    bd = lambda w: jnp.kron(eye, w)
    tdf_w1 = bd(raw["W1"][:fed, :])            # [pred*fed, pred*dff]
    tdd_w1 = bd(raw["W1"][fed:, :])            # [pred*dec, pred*dff]
    td_w2 = bd(raw["W2"])                      # [pred*dff, pred]
    tdf_w3 = bd(raw["W3"][:fed, :])            # [pred*fed, pred]
    tdd_w3 = bd(raw["W3"][fed:, :])            # [pred*dec, pred]
    padp = lambda v: jnp.pad(v, ((0, 0), (0, p_dff - v.shape[1])))
    td_v = jnp.concatenate(
        [jnp.tile(raw["b1"], (1, pred_len)),                      # b1 tiled   [1, pred*dff]
         padp(jnp.tile(raw["b2"] + raw["b3"], (1, pred_len))),    # b2+b3      [1, pred] padded
         padp(jnp.tile(raw["g"], (1, pred_len))),                 # gamma
         padp(jnp.tile(raw["beta"], (1, pred_len)))], axis=0)     # beta       -> [4, pred*dff]
    return {
        "td_d_w1":  tdd_w1.astype(MATMUL_DTYPE),
        "td_w2":    td_w2.astype(MATMUL_DTYPE),
        "td_d_w3":  tdd_w3.astype(MATMUL_DTYPE),
        "td_f_w13": jnp.concatenate([tdf_w1, tdf_w3], axis=1).astype(MATMUL_DTYPE),
        "td_v":     td_v,
    }


def init_tide_params(key, cfg):
    freq_map = {'h': 4, 't': 5, 's': 6, 'm': 1, 'a': 1, 'w': 2, 'd': 3, 'b': 3}
    feature_dim = freq_map[cfg["freq"]]
    seq_len, pred_len = cfg["seq_len"], cfg["pred_len"]
    hid, fed = cfg["d_model"], cfg["feature_encode_dim"]
    decode_dim, dff = cfg["c_out"], cfg["d_ff"]
    flatten_dim = seq_len + (seq_len + pred_len) * fed

    keys = jax.random.split(key, 7)
    wr, br = _init_linear(keys[6], seq_len, pred_len)
    params = {
        "feature_encoder": _pack_resblock(_init_resblock_raw(keys[0], feature_dim, hid, fed)),
        # PyTorch `*[ResBlock(...)] * (n-1)` repeats the SAME module instance -> shared params.
        "enc_rep":  _pack_resblock(_init_resblock_raw(keys[2], hid, hid, hid)),
        "dec_rep":  _pack_resblock(_init_resblock_raw(keys[3], hid, hid, hid)),
        "dec_last": _pack_resblock(_init_resblock_raw(keys[4], hid, hid, decode_dim * pred_len)),
    }
    params.update(_pack_enc0(_init_resblock_raw(keys[1], flatten_dim, hid, hid),
                             wr, br, seq_len))
    params.update(_pack_temporal(_init_resblock_raw(keys[5], decode_dim + fed, dff, 1),
                                 pred_len, fed, dff))
    return params, feature_dim


# --------------------------------------------------------------------------------------
# Forward pass (matches TiDE.forward / forward_xformer, eval mode)
# --------------------------------------------------------------------------------------

def tide_forward(history_data, future_data, params, cfg):
    seq_len, pred_len = cfg["seq_len"], cfg["pred_len"]
    fed = cfg["feature_encode_dim"]
    B, _, N, _ = history_data.shape
    T = seq_len + pred_len

    # data_transformation_4_xformer (start_token_len = 0); x_dec is unused by TiDE.
    x_enc = history_data[..., 0]                      # [B, seq_len, N]  channel 0 = target
    x_mark_enc = history_data[:, :, 0, 1:]            # [B, seq_len, F]  time marks
    y_mark = future_data[:, :, 0, 1:]                 # [B, pred_len, F]
    # (the reference concatenates twice; the second concat is a no-op.)
    bym = jnp.concatenate([x_mark_enc, y_mark], axis=1)          # [B, T, F]

    # Feature encoder (Pallas, row-gridded): shared by every series of a batch element.
    f_dim = bym.shape[-1]
    feat = feature_encode(bym.reshape(B * T, f_dim), params["feature_encoder"])  # [B*T, fed]
    feat_flat = feat.reshape(B, 1, T * fed)
    # Future-time features pre-split in the wrapper (free layout plumbing): the kernel never
    # lane-slices feat at a non-128-aligned offset.
    feat_fut = feat.reshape(B, T, fed)[:, seq_len:, :].reshape(B, 1, pred_len * fed)

    # [B, N, seq_len]: series becomes the row-block grid axis; features are NOT repeated N x.
    x_series = jnp.transpose(x_enc, (0, 2, 1))

    out = tide_fused(x_series, feat_flat, feat_fut, params, cfg)   # [B, N, pred_len]
    return jnp.transpose(out, (0, 2, 1))[..., None]                # [B, pred_len, N, 1]


# --------------------------------------------------------------------------------------

if __name__ == "__main__":
    cfg = dict(
        seq_len=16, label_len=0, pred_len=8,
        d_model=32, e_layers=2, d_layers=2,
        freq="h", bias=True, feature_encode_dim=4,
        c_out=4, d_ff=16, dropout=0.1,
    )

    key = jax.random.PRNGKey(0)
    kp, kh, kf = jax.random.split(key, 3)
    params, feature_dim = init_tide_params(kp, cfg)

    B, N = 2, 3
    C = 1 + feature_dim                                        # target + time marks
    history_data = jax.random.normal(kh, (B, cfg["seq_len"], N, C), jnp.float32)
    future_data = jax.random.normal(kf, (B, cfg["pred_len"], N, C), jnp.float32)

    fwd = jax.jit(functools.partial(tide_forward, cfg=cfg))
    out = jax.block_until_ready(fwd(history_data, future_data, params))

    assert out.shape == (B, cfg["pred_len"], N, 1), out.shape
    assert bool(jnp.all(jnp.isfinite(out)))
    print("KERNEL_OK")
</pallas_src>

<mosaic_0001>
module attributes {stable_mosaic.version = 11 : i64} {
  func.func @_fe_kernel(%arg0: i32, %arg1: memref<48x4xf32, #tpu.memory_space<vmem>>, %arg2: memref<4x32xf32, #tpu.memory_space<vmem>>, %arg3: memref<36x4xf32, #tpu.memory_space<vmem>>, %arg4: memref<4x32xf32, #tpu.memory_space<vmem>>, %arg5: memref<48x4xf32, #tpu.memory_space<vmem>>) attributes {dimension_semantics = [#tpu.dimension_semantics<parallel>], iteration_bounds = array<i64: 1>, scalar_prefetch = 0 : i64, scratch_operands = 0 : i64, tpu.core_type = #tpu.core_type<tc>, window_params = [{transform_indices = @transform_0, window_bounds = array<i64: 48, 4>}, {pipeline_mode = #tpu.pipeline_mode<synchronous>, transform_indices = @transform_1, window_bounds = array<i64: 4, 32>}, {pipeline_mode = #tpu.pipeline_mode<synchronous>, transform_indices = @transform_2, window_bounds = array<i64: 36, 4>}, {pipeline_mode = #tpu.pipeline_mode<synchronous>, transform_indices = @transform_3, window_bounds = array<i64: 4, 32>}, {transform_indices = @transform_4, window_bounds = array<i64: 48, 4>}]} {
    %c0 = arith.constant 0 : index
    %c0_0 = arith.constant 0 : index
    %0 = vector.load %arg1[%c0, %c0_0] : memref<48x4xf32, #tpu.memory_space<vmem>>, vector<48x4xf32>
    %c0_1 = arith.constant 0 : index
    %c0_2 = arith.constant 0 : index
    %1 = vector.load %arg2[%c0_1, %c0_2] : memref<4x32xf32, #tpu.memory_space<vmem>>, vector<4x32xf32>
    %c0_3 = arith.constant 0 : index
    %c0_4 = arith.constant 0 : index
    %2 = vector.load %arg3[%c0_3, %c0_4] : memref<36x4xf32, #tpu.memory_space<vmem>>, vector<36x4xf32>
    %c0_5 = arith.constant 0 : index
    %c0_6 = arith.constant 0 : index
    %3 = vector.load %arg4[%c0_5, %c0_6] : memref<4x32xf32, #tpu.memory_space<vmem>>, vector<4x32xf32>
    %cst = arith.constant dense<0.000000e+00> : vector<48x32xf32>
    %4 = tpu.matmul %0, %1, %cst {dimension_numbers = #tpu.dot_dimension_numbers<[1], [0], [0], [1], [0, 0, 1, 1], [], []>} : vector<48x4xf32>, vector<4x32xf32>, vector<48x32xf32> -> vector<48x32xf32>
    %5 = vector.extract_strided_slice %3 {offsets = [0, 0], sizes = [1, 32], strides = [1, 1]} : vector<4x32xf32> to vector<1x32xf32>
    %6 = vector.broadcast %5 : vector<1x32xf32> to vector<48x32xf32>
    %7 = arith.addf %4, %6 : vector<48x32xf32>
    %cst_7 = arith.constant 0.000000e+00 : f32
    %8 = vector.broadcast %cst_7 : f32 to vector<48x32xf32>
    %9 = arith.maximumf %7, %8 : vector<48x32xf32>
    %10 = vector.extract_strided_slice %2 {offsets = [0, 0], sizes = [32, 4], strides = [1, 1]} : vector<36x4xf32> to vector<32x4xf32>
    %cst_8 = arith.constant dense<0.000000e+00> : vector<48x4xf32>
    %11 = tpu.matmul %9, %10, %cst_8 {dimension_numbers = #tpu.dot_dimension_numbers<[1], [0], [0], [1], [0, 0, 1, 1], [], []>} : vector<48x32xf32>, vector<32x4xf32>, vector<48x4xf32> -> vector<48x4xf32>
    %12 = vector.extract_strided_slice %2 {offsets = [32, 0], sizes = [4, 4], strides = [1, 1]} : vector<36x4xf32> to vector<4x4xf32>
    %cst_9 = arith.constant dense<0.000000e+00> : vector<48x4xf32>
    %13 = tpu.matmul %0, %12, %cst_9 {dimension_numbers = #tpu.dot_dimension_numbers<[1], [0], [0], [1], [0, 0, 1, 1], [], []>} : vector<48x4xf32>, vector<4x4xf32>, vector<48x4xf32> -> vector<48x4xf32>
    %14 = arith.addf %11, %13 : vector<48x4xf32>
    %15 = vector.extract_strided_slice %3 {offsets = [1, 0], sizes = [1, 4], strides = [1, 1]} : vector<4x32xf32> to vector<1x4xf32>
    %16 = vector.broadcast %15 : vector<1x4xf32> to vector<48x4xf32>
    %17 = arith.addf %14, %16 : vector<48x4xf32>
    %18 = vector.extract_strided_slice %3 {offsets = [2, 0], sizes = [1, 4], strides = [1, 1]} : vector<4x32xf32> to vector<1x4xf32>
    %19 = vector.extract_strided_slice %3 {offsets = [3, 0], sizes = [1, 4], strides = [1, 1]} : vector<4x32xf32> to vector<1x4xf32>
    %cst_10 = arith.constant dense<0.000000e+00> : vector<48xf32>
    %20 = vector.multi_reduction <add>, %17, %cst_10 [1] : vector<48x4xf32> to vector<48xf32>
    %21 = vector.shape_cast %20 : vector<48xf32> to vector<48x1xf32>
    %cst_11 = arith.constant 4.000000e+00 : f32
    %22 = vector.broadcast %cst_11 : f32 to vector<48x1xf32>
    %23 = arith.divf %21, %22 : vector<48x1xf32>
    %24 = vector.broadcast %23 : vector<48x1xf32> to vector<48x4xf32>
    %25 = arith.subf %17, %24 : vector<48x4xf32>
    %26 = arith.mulf %25, %25 : vector<48x4xf32>
    %cst_12 = arith.constant dense<0.000000e+00> : vector<48xf32>
    %27 = vector.multi_reduction <add>, %26, %cst_12 [1] : vector<48x4xf32> to vector<48xf32>
    %28 = vector.shape_cast %27 : vector<48xf32> to vector<48x1xf32>
    %cst_13 = arith.constant 4.000000e+00 : f32
    %29 = vector.broadcast %cst_13 : f32 to vector<48x1xf32>
    %30 = arith.divf %28, %29 : vector<48x1xf32>
    %cst_14 = arith.constant 9.99999974E-6 : f32
    %31 = vector.broadcast %cst_14 : f32 to vector<48x1xf32>
    %32 = arith.addf %30, %31 : vector<48x1xf32>
    %33 = math.rsqrt %32 : vector<48x1xf32>
    %34 = vector.broadcast %33 : vector<48x1xf32> to vector<48x4xf32>
    %35 = arith.mulf %25, %34 : vector<48x4xf32>
    %36 = vector.broadcast %18 : vector<1x4xf32> to vector<48x4xf32>
    %37 = arith.mulf %35, %36 : vector<48x4xf32>
    %38 = vector.broadcast %19 : vector<1x4xf32> to vector<48x4xf32>
    %39 = arith.addf %37, %38 : vector<48x4xf32>
    %c0_15 = arith.constant 0 : index
    %c0_16 = arith.constant 0 : index
    %40 = vector.load %arg5[%c0_15, %c0_16] : memref<48x4xf32, #tpu.memory_space<vmem>>, vector<48x4xf32>
    tpu.vector_store %arg5[%c0_15, %c0_16], %39 {strides = array<i32>} : memref<48x4xf32, #tpu.memory_space<vmem>>, vector<48x4xf32>,
    return
  }
  func.func @transform_0(%arg0: i32) -> (i32, i32) {
    %c0_i32 = arith.constant 0 : i32
    %c0_i32_0 = arith.constant 0 : i32
    return %arg0, %c0_i32 : i32, i32
  }
  func.func @transform_1(%arg0: i32) -> (i32, i32) {
    %c0_i32 = arith.constant 0 : i32
    %c0_i32_0 = arith.constant 0 : i32
    %c0_i32_1 = arith.constant 0 : i32
    return %c0_i32, %c0_i32_0 : i32, i32
  }
  func.func @transform_2(%arg0: i32) -> (i32, i32) {
    %c0_i32 = arith.constant 0 : i32
    %c0_i32_0 = arith.constant 0 : i32
    %c0_i32_1 = arith.constant 0 : i32
    return %c0_i32, %c0_i32_0 : i32, i32
  }
  func.func @transform_3(%arg0: i32) -> (i32, i32) {
    %c0_i32 = arith.constant 0 : i32
    %c0_i32_0 = arith.constant 0 : i32
    %c0_i32_1 = arith.constant 0 : i32
    return %c0_i32, %c0_i32_0 : i32, i32
  }
  func.func @transform_4(%arg0: i32) -> (i32, i32) {
    %c0_i32 = arith.constant 0 : i32
    %c0_i32_0 = arith.constant 0 : i32
    return %arg0, %c0_i32 : i32, i32
  }
}

module attributes {stable_mosaic.version = 11 : i64} {
  func.func @_tide_fused_kernel(%arg0: i32, %arg1: i32, %arg2: memref<1x8x16xf32, #tpu.memory_space<vmem>>, %arg3: memref<1x1x96xf32, #tpu.memory_space<vmem>>, %arg4: memref<1x1x32xf32, #tpu.memory_space<vmem>>, %arg5: memref<16x40xf32, #tpu.memory_space<vmem>>, %arg6: memref<96x64xf32, #tpu.memory_space<vmem>>, %arg7: memref<32x32xf32, #tpu.memory_space<vmem>>, %arg8: memref<16x32xf32, #tpu.memory_space<vmem>>, %arg9: memref<4x32xf32, #tpu.memory_space<vmem>>, %arg10: memref<1x8xf32, #tpu.memory_space<vmem>>, %arg11: memref<32x32xf32, #tpu.memory_space<vmem>>, %arg12: memref<64x32xf32, #tpu.memory_space<vmem>>, %arg13: memref<4x32xf32, #tpu.memory_space<vmem>>, %arg14: memref<32x32xf32, #tpu.memory_space<vmem>>, %arg15: memref<64x32xf32, #tpu.memory_space<vmem>>, %arg16: memref<4x32xf32, #tpu.memory_space<vmem>>, %arg17: memref<32x32xf32, #tpu.memory_space<vmem>>, %arg18: memref<64x32xf32, #tpu.memory_space<vmem>>, %arg19: memref<4x32xf32, #tpu.memory_space<vmem>>, %arg20: memref<32x128xf32, #tpu.memory_space<vmem>>, %arg21: memref<128x8xf32, #tpu.memory_space<vmem>>, %arg22: memref<32x8xf32, #tpu.memory_space<vmem>>, %arg23: memref<32x136xf32, #tpu.memory_space<vmem>>, %arg24: memref<4x128xf32, #tpu.memory_space<vmem>>, %arg25: memref<1x8x8xf32, #tpu.memory_space<vmem>>) attributes {dimension_semantics = [#tpu.dimension_semantics<parallel>, #tpu.dimension_semantics<parallel>], iteration_bounds = array<i64: 2, 1>, scalar_prefetch = 0 : i64, scratch_operands = 0 : i64, tpu.core_type = #tpu.core_type<tc>, window_params = [{transform_indices = @transform_0, window_bounds = array<i64: 1, 8, 16>}, {transform_indices = @transform_1, window_bounds = array<i64: 1, 1, 96>}, {transform_indices = @transform_2, window_bounds = array<i64: 1, 1, 32>}, {pipeline_mode = #tpu.pipeline_mode<synchronous>, transform_indices = @transform_3, window_bounds = array<i64: 16, 40>}, {pipeline_mode = #tpu.pipeline_mode<synchronous>, transform_indices = @transform_4, window_bounds = array<i64: 96, 64>}, {pipeline_mode = #tpu.pipeline_mode<synchronous>, transform_indices = @transform_5, window_bounds = array<i64: 32, 32>}, {pipeline_mode = #tpu.pipeline_mode<synchronous>, transform_indices = @transform_6, window_bounds = array<i64: 16, 32>}, {pipeline_mode = #tpu.pipeline_mode<synchronous>, transform_indices = @transform_7, window_bounds = array<i64: 4, 32>}, {pipeline_mode = #tpu.pipeline_mode<synchronous>, transform_indices = @transform_8, window_bounds = array<i64: 1, 8>}, {pipeline_mode = #tpu.pipeline_mode<synchronous>, transform_indices = @transform_9, window_bounds = array<i64: 32, 32>}, {pipeline_mode = #tpu.pipeline_mode<synchronous>, transform_indices = @transform_10, window_bounds = array<i64: 64, 32>}, {pipeline_mode = #tpu.pipeline_mode<synchronous>, transform_indices = @transform_11, window_bounds = array<i64: 4, 32>}, {pipeline_mode = #tpu.pipeline_mode<synchronous>, transform_indices = @transform_12, window_bounds = array<i64: 32, 32>}, {pipeline_mode = #tpu.pipeline_mode<synchronous>, transform_indices = @transform_13, window_bounds = array<i64: 64, 32>}, {pipeline_mode = #tpu.pipeline_mode<synchronous>, transform_indices = @transform_14, window_bounds = array<i64: 4, 32>}, {pipeline_mode = #tpu.pipeline_mode<synchronous>, transform_indices = @transform_15, window_bounds = array<i64: 32, 32>}, {pipeline_mode = #tpu.pipeline_mode<synchronous>, transform_indices = @transform_16, window_bounds = array<i64: 64, 32>}, {pipeline_mode = #tpu.pipeline_mode<synchronous>, transform_indices = @transform_17, window_bounds = array<i64: 4, 32>}, {pipeline_mode = #tpu.pipeline_mode<synchronous>, transform_indices = @transform_18, window_bounds = array<i64: 32, 128>}, {pipeline_mode = #tpu.pipeline_mode<synchronous>, transform_indices = @transform_19, window_bounds = array<i64: 128, 8>}, {pipeline_mode = #tpu.pipeline_mode<synchronous>, transform_indices = @transform_20, window_bounds = array<i64: 32, 8>}, {pipeline_mode = #tpu.pipeline_mode<synchronous>, transform_indices = @transform_21, window_bounds = array<i64: 32, 136>}, {pipeline_mode = #tpu.pipeline_mode<synchronous>, transform_indices = @transform_22, window_bounds = array<i64: 4, 128>}, {transform_indices = @transform_23, window_bounds = array<i64: 1, 8, 8>}]} {
    %c0 = arith.constant 0 : index
    %c0_0 = arith.constant 0 : index
    %c0_1 = arith.constant 0 : index
    %0 = vector.load %arg2[%c0, %c0_0, %c0_1] : memref<1x8x16xf32, #tpu.memory_space<vmem>>, vector<1x8x16xf32>
    %1 = vector.shape_cast %0 : vector<1x8x16xf32> to vector<8x16xf32>
    %c0_2 = arith.constant 0 : index
    %c0_3 = arith.constant 0 : index
    %c0_4 = arith.constant 0 : index
    %2 = vector.load %arg3[%c0_2, %c0_3, %c0_4] : memref<1x1x96xf32, #tpu.memory_space<vmem>>, vector<1x1x96xf32>
    %3 = vector.shape_cast %2 : vector<1x1x96xf32> to vector<1x96xf32>
    %c0_5 = arith.constant 0 : index
    %c0_6 = arith.constant 0 : index
    %c0_7 = arith.constant 0 : index
    %4 = vector.load %arg4[%c0_5, %c0_6, %c0_7] : memref<1x1x32xf32, #tpu.memory_space<vmem>>, vector<1x1x32xf32>
    %5 = vector.shape_cast %4 : vector<1x1x32xf32> to vector<1x32xf32>
    %cst = arith.constant dense<0.000000e+00> : vector<8xf32>
    %6 = vector.multi_reduction <add>, %1, %cst [1] : vector<8x16xf32> to vector<8xf32>
    %7 = vector.shape_cast %6 : vector<8xf32> to vector<8x1xf32>
    %cst_8 = arith.constant 1.600000e+01 : f32
    %8 = vector.broadcast %cst_8 : f32 to vector<8x1xf32>
    %9 = arith.divf %7, %8 : vector<8x1xf32>
    %10 = vector.broadcast %9 : vector<8x1xf32> to vector<8x16xf32>
    %11 = arith.subf %1, %10 : vector<8x16xf32>
    %12 = arith.mulf %11, %11 : vector<8x16xf32>
    %cst_9 = arith.constant dense<0.000000e+00> : vector<8xf32>
    %13 = vector.multi_reduction <add>, %12, %cst_9 [1] : vector<8x16xf32> to vector<8xf32>
    %14 = vector.shape_cast %13 : vector<8xf32> to vector<8x1xf32>
    %cst_10 = arith.constant 1.600000e+01 : f32
    %15 = vector.broadcast %cst_10 : f32 to vector<8x1xf32>
    %16 = arith.divf %14, %15 : vector<8x1xf32>
    %cst_11 = arith.constant 9.99999974E-6 : f32
    %17 = vector.broadcast %cst_11 : f32 to vector<8x1xf32>
    %18 = arith.addf %16, %17 : vector<8x1xf32>
    %19 = math.sqrt %18 : vector<8x1xf32>
    %cst_12 = arith.constant 9.99999974E-6 : f32
    %20 = vector.broadcast %cst_12 : f32 to vector<8x1xf32>
    %21 = arith.addf %16, %20 : vector<8x1xf32>
    %22 = math.rsqrt %21 : vector<8x1xf32>
    %23 = vector.broadcast %22 : vector<8x1xf32> to vector<8x16xf32>
    %24 = arith.mulf %11, %23 : vector<8x16xf32>
    %c0_13 = arith.constant 0 : index
    %c0_14 = arith.constant 0 : index
    %25 = vector.load %arg5[%c0_13, %c0_14] : memref<16x40xf32, #tpu.memory_space<vmem>>, vector<16x40xf32>
    %cst_15 = arith.constant dense<0.000000e+00> : vector<8x40xf32>
    %26 = tpu.matmul %24, %25, %cst_15 {dimension_numbers = #tpu.dot_dimension_numbers<[1], [0], [0], [1], [0, 0, 1, 1], [], []>} : vector<8x16xf32>, vector<16x40xf32>, vector<8x40xf32> -> vector<8x40xf32>
    %c0_16 = arith.constant 0 : index
    %c0_17 = arith.constant 0 : index
    %27 = vector.load %arg6[%c0_16, %c0_17] : memref<96x64xf32, #tpu.memory_space<vmem>>, vector<96x64xf32>
    %cst_18 = arith.constant dense<0.000000e+00> : vector<1x64xf32>
    %28 = tpu.matmul %3, %27, %cst_18 {dimension_numbers = #tpu.dot_dimension_numbers<[1], [0], [0], [1], [0, 0, 1, 1], [], []>} : vector<1x96xf32>, vector<96x64xf32>, vector<1x64xf32> -> vector<1x64xf32>
    %c0_19 = arith.constant 0 : index
    %c0_20 = arith.constant 0 : index
    %29 = vector.load %arg9[%c0_19, %c0_20] : memref<4x32xf32, #tpu.memory_space<vmem>>, vector<4x32xf32>
    %30 = vector.extract_strided_slice %26 {offsets = [0, 0], sizes = [8, 32], strides = [1, 1]} : vector<8x40xf32> to vector<8x32xf32>
    %31 = vector.extract_strided_slice %28 {offsets = [0, 0], sizes = [1, 32], strides = [1, 1]} : vector<1x64xf32> to vector<1x32xf32>
    %32 = vector.broadcast %31 : vector<1x32xf32> to vector<8x32xf32>
    %33 = arith.addf %30, %32 : vector<8x32xf32>
    %34 = vector.extract_strided_slice %29 {offsets = [0, 0], sizes = [1, 32], strides = [1, 1]} : vector<4x32xf32> to vector<1x32xf32>
    %35 = vector.broadcast %34 : vector<1x32xf32> to vector<8x32xf32>
    %36 = arith.addf %33, %35 : vector<8x32xf32>
    %cst_21 = arith.constant 0.000000e+00 : f32
    %37 = vector.broadcast %cst_21 : f32 to vector<8x32xf32>
    %38 = arith.maximumf %36, %37 : vector<8x32xf32>
    %c0_22 = arith.constant 0 : index
    %c0_23 = arith.constant 0 : index
    %39 = vector.load %arg7[%c0_22, %c0_23] : memref<32x32xf32, #tpu.memory_space<vmem>>, vector<32x32xf32>
    %cst_24 = arith.constant dense<0.000000e+00> : vector<8x32xf32>
    %40 = tpu.matmul %38, %39, %cst_24 {dimension_numbers = #tpu.dot_dimension_numbers<[1], [0], [0], [1], [0, 0, 1, 1], [], []>} : vector<8x32xf32>, vector<32x32xf32>, vector<8x32xf32> -> vector<8x32xf32>
    %c0_25 = arith.constant 0 : index
    %c0_26 = arith.constant 0 : index
    %41 = vector.load %arg8[%c0_25, %c0_26] : memref<16x32xf32, #tpu.memory_space<vmem>>, vector<16x32xf32>
    %cst_27 = arith.constant dense<0.000000e+00> : vector<8x32xf32>
    %42 = tpu.matmul %24, %41, %cst_27 {dimension_numbers = #tpu.dot_dimension_numbers<[1], [0], [0], [1], [0, 0, 1, 1], [], []>} : vector<8x16xf32>, vector<16x32xf32>, vector<8x32xf32> -> vector<8x32xf32>
    %43 = arith.addf %40, %42 : vector<8x32xf32>
    %44 = vector.extract_strided_slice %28 {offsets = [0, 32], sizes = [1, 32], strides = [1, 1]} : vector<1x64xf32> to vector<1x32xf32>
    %45 = vector.broadcast %44 : vector<1x32xf32> to vector<8x32xf32>
    %46 = arith.addf %43, %45 : vector<8x32xf32>
    %47 = vector.extract_strided_slice %29 {offsets = [1, 0], sizes = [1, 32], strides = [1, 1]} : vector<4x32xf32> to vector<1x32xf32>
    %48 = vector.broadcast %47 : vector<1x32xf32> to vector<8x32xf32>
    %49 = arith.addf %46, %48 : vector<8x32xf32>
    %50 = vector.extract_strided_slice %29 {offsets = [2, 0], sizes = [1, 32], strides = [1, 1]} : vector<4x32xf32> to vector<1x32xf32>
    %51 = vector.extract_strided_slice %29 {offsets = [3, 0], sizes = [1, 32], strides = [1, 1]} : vector<4x32xf32> to vector<1x32xf32>
    %cst_28 = arith.constant dense<0.000000e+00> : vector<8xf32>
    %52 = vector.multi_reduction <add>, %49, %cst_28 [1] : vector<8x32xf32> to vector<8xf32>
    %53 = vector.shape_cast %52 : vector<8xf32> to vector<8x1xf32>
    %cst_29 = arith.constant 3.200000e+01 : f32
    %54 = vector.broadcast %cst_29 : f32 to vector<8x1xf32>
    %55 = arith.divf %53, %54 : vector<8x1xf32>
    %56 = vector.broadcast %55 : vector<8x1xf32> to vector<8x32xf32>
    %57 = arith.subf %49, %56 : vector<8x32xf32>
    %58 = arith.mulf %57, %57 : vector<8x32xf32>
    %cst_30 = arith.constant dense<0.000000e+00> : vector<8xf32>
    %59 = vector.multi_reduction <add>, %58, %cst_30 [1] : vector<8x32xf32> to vector<8xf32>
    %60 = vector.shape_cast %59 : vector<8xf32> to vector<8x1xf32>
    %cst_31 = arith.constant 3.200000e+01 : f32
    %61 = vector.broadcast %cst_31 : f32 to vector<8x1xf32>
    %62 = arith.divf %60, %61 : vector<8x1xf32>
    %cst_32 = arith.constant 9.99999974E-6 : f32
    %63 = vector.broadcast %cst_32 : f32 to vector<8x1xf32>
    %64 = arith.addf %62, %63 : vector<8x1xf32>
    %65 = math.rsqrt %64 : vector<8x1xf32>
    %66 = vector.broadcast %65 : vector<8x1xf32> to vector<8x32xf32>
    %67 = arith.mulf %57, %66 : vector<8x32xf32>
    %68 = vector.broadcast %50 : vector<1x32xf32> to vector<8x32xf32>
    %69 = arith.mulf %67, %68 : vector<8x32xf32>
    %70 = vector.broadcast %51 : vector<1x32xf32> to vector<8x32xf32>
    %71 = arith.addf %69, %70 : vector<8x32xf32>
    %72 = vector.extract_strided_slice %26 {offsets = [0, 32], sizes = [8, 8], strides = [1, 1]} : vector<8x40xf32> to vector<8x8xf32>
    %c0_33 = arith.constant 0 : index
    %c0_34 = arith.constant 0 : index
    %73 = vector.load %arg10[%c0_33, %c0_34] : memref<1x8xf32, #tpu.memory_space<vmem>>, vector<1x8xf32>
    %74 = vector.broadcast %73 : vector<1x8xf32> to vector<8x8xf32>
    %75 = arith.addf %72, %74 : vector<8x8xf32>
    %c0_35 = arith.constant 0 : index
    %c0_36 = arith.constant 0 : index
    %76 = vector.load %arg11[%c0_35, %c0_36] : memref<32x32xf32, #tpu.memory_space<vmem>>, vector<32x32xf32>
    %c0_37 = arith.constant 0 : index
    %c0_38 = arith.constant 0 : index
    %77 = vector.load %arg12[%c0_37, %c0_38] : memref<64x32xf32, #tpu.memory_space<vmem>>, vector<64x32xf32>
    %c0_39 = arith.constant 0 : index
    %c0_40 = arith.constant 0 : index
    %78 = vector.load %arg13[%c0_39, %c0_40] : memref<4x32xf32, #tpu.memory_space<vmem>>, vector<4x32xf32>
    %c0_i32 = arith.constant 0 : i32
    %cst_41 = arith.constant dense<0.000000e+00> : vector<8x32xf32>
    %79 = tpu.matmul %71, %76, %cst_41 {dimension_numbers = #tpu.dot_dimension_numbers<[1], [0], [0], [1], [0, 0, 1, 1], [], []>} : vector<8x32xf32>, vector<32x32xf32>, vector<8x32xf32> -> vector<8x32xf32>
    %80 = vector.extract_strided_slice %78 {offsets = [0, 0], sizes = [1, 32], strides = [1, 1]} : vector<4x32xf32> to vector<1x32xf32>
    %81 = vector.broadcast %80 : vector<1x32xf32> to vector<8x32xf32>
    %82 = arith.addf %79, %81 : vector<8x32xf32>
    %cst_42 = arith.constant 0.000000e+00 : f32
    %83 = vector.broadcast %cst_42 : f32 to vector<8x32xf32>
    %84 = arith.maximumf %82, %83 : vector<8x32xf32>
    %85 = vector.extract_strided_slice %77 {offsets = [0, 0], sizes = [32, 32], strides = [1, 1]} : vector<64x32xf32> to vector<32x32xf32>
    %cst_43 = arith.constant dense<0.000000e+00> : vector<8x32xf32>
    %86 = tpu.matmul %84, %85, %cst_43 {dimension_numbers = #tpu.dot_dimension_numbers<[1], [0], [0], [1], [0, 0, 1, 1], [], []>} : vector<8x32xf32>, vector<32x32xf32>, vector<8x32xf32> -> vector<8x32xf32>
    %87 = vector.extract_strided_slice %77 {offsets = [32, 0], sizes = [32, 32], strides = [1, 1]} : vector<64x32xf32> to vector<32x32xf32>
    %cst_44 = arith.constant dense<0.000000e+00> : vector<8x32xf32>
    %88 = tpu.matmul %71, %87, %cst_44 {dimension_numbers = #tpu.dot_dimension_numbers<[1], [0], [0], [1], [0, 0, 1, 1], [], []>} : vector<8x32xf32>, vector<32x32xf32>, vector<8x32xf32> -> vector<8x32xf32>
    %89 = arith.addf %86, %88 : vector<8x32xf32>
    %90 = vector.extract_strided_slice %78 {offsets = [1, 0], sizes = [1, 32], strides = [1, 1]} : vector<4x32xf32> to vector<1x32xf32>
    %91 = vector.broadcast %90 : vector<1x32xf32> to vector<8x32xf32>
    %92 = arith.addf %89, %91 : vector<8x32xf32>
    %93 = vector.extract_strided_slice %78 {offsets = [2, 0], sizes = [1, 32], strides = [1, 1]} : vector<4x32xf32> to vector<1x32xf32>
    %94 = vector.extract_strided_slice %78 {offsets = [3, 0], sizes = [1, 32], strides = [1, 1]} : vector<4x32xf32> to vector<1x32xf32>
    %cst_45 = arith.constant dense<0.000000e+00> : vector<8xf32>
    %95 = vector.multi_reduction <add>, %92, %cst_45 [1] : vector<8x32xf32> to vector<8xf32>
    %96 = vector.shape_cast %95 : vector<8xf32> to vector<8x1xf32>
    %cst_46 = arith.constant 3.200000e+01 : f32
    %97 = vector.broadcast %cst_46 : f32 to vector<8x1xf32>
    %98 = arith.divf %96, %97 : vector<8x1xf32>
    %99 = vector.broadcast %98 : vector<8x1xf32> to vector<8x32xf32>
    %100 = arith.subf %92, %99 : vector<8x32xf32>
    %101 = arith.mulf %100, %100 : vector<8x32xf32>
    %cst_47 = arith.constant dense<0.000000e+00> : vector<8xf32>
    %102 = vector.multi_reduction <add>, %101, %cst_47 [1] : vector<8x32xf32> to vector<8xf32>
    %103 = vector.shape_cast %102 : vector<8xf32> to vector<8x1xf32>
    %cst_48 = arith.constant 3.200000e+01 : f32
    %104 = vector.broadcast %cst_48 : f32 to vector<8x1xf32>
    %105 = arith.divf %103, %104 : vector<8x1xf32>
    %cst_49 = arith.constant 9.99999974E-6 : f32
    %106 = vector.broadcast %cst_49 : f32 to vector<8x1xf32>
    %107 = arith.addf %105, %106 : vector<8x1xf32>
    %108 = math.rsqrt %107 : vector<8x1xf32>
    %109 = vector.broadcast %108 : vector<8x1xf32> to vector<8x32xf32>
    %110 = arith.mulf %100, %109 : vector<8x32xf32>
    %111 = vector.broadcast %93 : vector<1x32xf32> to vector<8x32xf32>
    %112 = arith.mulf %110, %111 : vector<8x32xf32>
    %113 = vector.broadcast %94 : vector<1x32xf32> to vector<8x32xf32>
    %114 = arith.addf %112, %113 : vector<8x32xf32>
    %c0_50 = arith.constant 0 : index
    %c0_51 = arith.constant 0 : index
    %115 = vector.load %arg14[%c0_50, %c0_51] : memref<32x32xf32, #tpu.memory_space<vmem>>, vector<32x32xf32>
    %c0_52 = arith.constant 0 : index
    %c0_53 = arith.constant 0 : index
    %116 = vector.load %arg15[%c0_52, %c0_53] : memref<64x32xf32, #tpu.memory_space<vmem>>, vector<64x32xf32>
    %c0_54 = arith.constant 0 : index
    %c0_55 = arith.constant 0 : index
    %117 = vector.load %arg16[%c0_54, %c0_55] : memref<4x32xf32, #tpu.memory_space<vmem>>, vector<4x32xf32>
    %c0_i32_56 = arith.constant 0 : i32
    %cst_57 = arith.constant dense<0.000000e+00> : vector<8x32xf32>
    %118 = tpu.matmul %114, %115, %cst_57 {dimension_numbers = #tpu.dot_dimension_numbers<[1], [0], [0], [1], [0, 0, 1, 1], [], []>} : vector<8x32xf32>, vector<32x32xf32>, vector<8x32xf32> -> vector<8x32xf32>
    %119 = vector.extract_strided_slice %117 {offsets = [0, 0], sizes = [1, 32], strides = [1, 1]} : vector<4x32xf32> to vector<1x32xf32>
    %120 = vector.broadcast %119 : vector<1x32xf32> to vector<8x32xf32>
    %121 = arith.addf %118, %120 : vector<8x32xf32>
    %cst_58 = arith.constant 0.000000e+00 : f32
    %122 = vector.broadcast %cst_58 : f32 to vector<8x32xf32>
    %123 = arith.maximumf %121, %122 : vector<8x32xf32>
    %124 = vector.extract_strided_slice %116 {offsets = [0, 0], sizes = [32, 32], strides = [1, 1]} : vector<64x32xf32> to vector<32x32xf32>
    %cst_59 = arith.constant dense<0.000000e+00> : vector<8x32xf32>
    %125 = tpu.matmul %123, %124, %cst_59 {dimension_numbers = #tpu.dot_dimension_numbers<[1], [0], [0], [1], [0, 0, 1, 1], [], []>} : vector<8x32xf32>, vector<32x32xf32>, vector<8x32xf32> -> vector<8x32xf32>
    %126 = vector.extract_strided_slice %116 {offsets = [32, 0], sizes = [32, 32], strides = [1, 1]} : vector<64x32xf32> to vector<32x32xf32>
    %cst_60 = arith.constant dense<0.000000e+00> : vector<8x32xf32>
    %127 = tpu.matmul %114, %126, %cst_60 {dimension_numbers = #tpu.dot_dimension_numbers<[1], [0], [0], [1], [0, 0, 1, 1], [], []>} : vector<8x32xf32>, vector<32x32xf32>, vector<8x32xf32> -> vector<8x32xf32>
    %128 = arith.addf %125, %127 : vector<8x32xf32>
    %129 = vector.extract_strided_slice %117 {offsets = [1, 0], sizes = [1, 32], strides = [1, 1]} : vector<4x32xf32> to vector<1x32xf32>
    %130 = vector.broadcast %129 : vector<1x32xf32> to vector<8x32xf32>
    %131 = arith.addf %128, %130 : vector<8x32xf32>
    %132 = vector.extract_strided_slice %117 {offsets = [2, 0], sizes = [1, 32], strides = [1, 1]} : vector<4x32xf32> to vector<1x32xf32>
    %133 = vector.extract_strided_slice %117 {offsets = [3, 0], sizes = [1, 32], strides = [1, 1]} : vector<4x32xf32> to vector<1x32xf32>
    %cst_61 = arith.constant dense<0.000000e+00> : vector<8xf32>
    %134 = vector.multi_reduction <add>, %131, %cst_61 [1] : vector<8x32xf32> to vector<8xf32>
    %135 = vector.shape_cast %134 : vector<8xf32> to vector<8x1xf32>
    %cst_62 = arith.constant 3.200000e+01 : f32
    %136 = vector.broadcast %cst_62 : f32 to vector<8x1xf32>
    %137 = arith.divf %135, %136 : vector<8x1xf32>
    %138 = vector.broadcast %137 : vector<8x1xf32> to vector<8x32xf32>
    %139 = arith.subf %131, %138 : vector<8x32xf32>
    %140 = arith.mulf %139, %139 : vector<8x32xf32>
    %cst_63 = arith.constant dense<0.000000e+00> : vector<8xf32>
    %141 = vector.multi_reduction <add>, %140, %cst_63 [1] : vector<8x32xf32> to vector<8xf32>
    %142 = vector.shape_cast %141 : vector<8xf32> to vector<8x1xf32>
    %cst_64 = arith.constant 3.200000e+01 : f32
    %143 = vector.broadcast %cst_64 : f32 to vector<8x1xf32>
    %144 = arith.divf %142, %143 : vector<8x1xf32>
    %cst_65 = arith.constant 9.99999974E-6 : f32
    %145 = vector.broadcast %cst_65 : f32 to vector<8x1xf32>
    %146 = arith.addf %144, %145 : vector<8x1xf32>
    %147 = math.rsqrt %146 : vector<8x1xf32>
    %148 = vector.broadcast %147 : vector<8x1xf32> to vector<8x32xf32>
    %149 = arith.mulf %139, %148 : vector<8x32xf32>
    %150 = vector.broadcast %132 : vector<1x32xf32> to vector<8x32xf32>
    %151 = arith.mulf %149, %150 : vector<8x32xf32>
    %152 = vector.broadcast %133 : vector<1x32xf32> to vector<8x32xf32>
    %153 = arith.addf %151, %152 : vector<8x32xf32>
    %c0_66 = arith.constant 0 : index
    %c0_67 = arith.constant 0 : index
    %154 = vector.load %arg17[%c0_66, %c0_67] : memref<32x32xf32, #tpu.memory_space<vmem>>, vector<32x32xf32>
    %c0_68 = arith.constant 0 : index
    %c0_69 = arith.constant 0 : index
    %155 = vector.load %arg18[%c0_68, %c0_69] : memref<64x32xf32, #tpu.memory_space<vmem>>, vector<64x32xf32>
    %c0_70 = arith.constant 0 : index
    %c0_71 = arith.constant 0 : index
    %156 = vector.load %arg19[%c0_70, %c0_71] : memref<4x32xf32, #tpu.memory_space<vmem>>, vector<4x32xf32>
    %cst_72 = arith.constant dense<0.000000e+00> : vector<8x32xf32>
    %157 = tpu.matmul %153, %154, %cst_72 {dimension_numbers = #tpu.dot_dimension_numbers<[1], [0], [0], [1], [0, 0, 1, 1], [], []>} : vector<8x32xf32>, vector<32x32xf32>, vector<8x32xf32> -> vector<8x32xf32>
    %158 = vector.extract_strided_slice %156 {offsets = [0, 0], sizes = [1, 32], strides = [1, 1]} : vector<4x32xf32> to vector<1x32xf32>
    %159 = vector.broadcast %158 : vector<1x32xf32> to vector<8x32xf32>
    %160 = arith.addf %157, %159 : vector<8x32xf32>
    %cst_73 = arith.constant 0.000000e+00 : f32
    %161 = vector.broadcast %cst_73 : f32 to vector<8x32xf32>
    %162 = arith.maximumf %160, %161 : vector<8x32xf32>
    %163 = vector.extract_strided_slice %155 {offsets = [0, 0], sizes = [32, 32], strides = [1, 1]} : vector<64x32xf32> to vector<32x32xf32>
    %cst_74 = arith.constant dense<0.000000e+00> : vector<8x32xf32>
    %164 = tpu.matmul %162, %163, %cst_74 {dimension_numbers = #tpu.dot_dimension_numbers<[1], [0], [0], [1], [0, 0, 1, 1], [], []>} : vector<8x32xf32>, vector<32x32xf32>, vector<8x32xf32> -> vector<8x32xf32>
    %165 = vector.extract_strided_slice %155 {offsets = [32, 0], sizes = [32, 32], strides = [1, 1]} : vector<64x32xf32> to vector<32x32xf32>
    %cst_75 = arith.constant dense<0.000000e+00> : vector<8x32xf32>
    %166 = tpu.matmul %153, %165, %cst_75 {dimension_numbers = #tpu.dot_dimension_numbers<[1], [0], [0], [1], [0, 0, 1, 1], [], []>} : vector<8x32xf32>, vector<32x32xf32>, vector<8x32xf32> -> vector<8x32xf32>
    %167 = arith.addf %164, %166 : vector<8x32xf32>
    %168 = vector.extract_strided_slice %156 {offsets = [1, 0], sizes = [1, 32], strides = [1, 1]} : vector<4x32xf32> to vector<1x32xf32>
    %169 = vector.broadcast %168 : vector<1x32xf32> to vector<8x32xf32>
    %170 = arith.addf %167, %169 : vector<8x32xf32>
    %171 = vector.extract_strided_slice %156 {offsets = [2, 0], sizes = [1, 32], strides = [1, 1]} : vector<4x32xf32> to vector<1x32xf32>
    %172 = vector.extract_strided_slice %156 {offsets = [3, 0], sizes = [1, 32], strides = [1, 1]} : vector<4x32xf32> to vector<1x32xf32>
    %cst_76 = arith.constant dense<0.000000e+00> : vector<8xf32>
    %173 = vector.multi_reduction <add>, %170, %cst_76 [1] : vector<8x32xf32> to vector<8xf32>
    %174 = vector.shape_cast %173 : vector<8xf32> to vector<8x1xf32>
    %cst_77 = arith.constant 3.200000e+01 : f32
    %175 = vector.broadcast %cst_77 : f32 to vector<8x1xf32>
    %176 = arith.divf %174, %175 : vector<8x1xf32>
    %177 = vector.broadcast %176 : vector<8x1xf32> to vector<8x32xf32>
    %178 = arith.subf %170, %177 : vector<8x32xf32>
    %179 = arith.mulf %178, %178 : vector<8x32xf32>
    %cst_78 = arith.constant dense<0.000000e+00> : vector<8xf32>
    %180 = vector.multi_reduction <add>, %179, %cst_78 [1] : vector<8x32xf32> to vector<8xf32>
    %181 = vector.shape_cast %180 : vector<8xf32> to vector<8x1xf32>
    %cst_79 = arith.constant 3.200000e+01 : f32
    %182 = vector.broadcast %cst_79 : f32 to vector<8x1xf32>
    %183 = arith.divf %181, %182 : vector<8x1xf32>
    %cst_80 = arith.constant 9.99999974E-6 : f32
    %184 = vector.broadcast %cst_80 : f32 to vector<8x1xf32>
    %185 = arith.addf %183, %184 : vector<8x1xf32>
    %186 = math.rsqrt %185 : vector<8x1xf32>
    %187 = vector.broadcast %186 : vector<8x1xf32> to vector<8x32xf32>
    %188 = arith.mulf %178, %187 : vector<8x32xf32>
    %189 = vector.broadcast %171 : vector<1x32xf32> to vector<8x32xf32>
    %190 = arith.mulf %188, %189 : vector<8x32xf32>
    %191 = vector.broadcast %172 : vector<1x32xf32> to vector<8x32xf32>
    %192 = arith.addf %190, %191 : vector<8x32xf32>
    %c0_81 = arith.constant 0 : index
    %c0_82 = arith.constant 0 : index
    %193 = vector.load %arg24[%c0_81, %c0_82] : memref<4x128xf32, #tpu.memory_space<vmem>>, vector<4x128xf32>
    %c0_83 = arith.constant 0 : index
    %c0_84 = arith.constant 0 : index
    %194 = vector.load %arg23[%c0_83, %c0_84] : memref<32x136xf32, #tpu.memory_space<vmem>>, vector<32x136xf32>
    %cst_85 = arith.constant dense<0.000000e+00> : vector<1x136xf32>
    %195 = tpu.matmul %5, %194, %cst_85 {dimension_numbers = #tpu.dot_dimension_numbers<[1], [0], [0], [1], [0, 0, 1, 1], [], []>} : vector<1x32xf32>, vector<32x136xf32>, vector<1x136xf32> -> vector<1x136xf32>
    %c0_86 = arith.constant 0 : index
    %c0_87 = arith.constant 0 : index
    %196 = vector.load %arg20[%c0_86, %c0_87] : memref<32x128xf32, #tpu.memory_space<vmem>>, vector<32x128xf32>
    %cst_88 = arith.constant dense<0.000000e+00> : vector<8x128xf32>
    %197 = tpu.matmul %192, %196, %cst_88 {dimension_numbers = #tpu.dot_dimension_numbers<[1], [0], [0], [1], [0, 0, 1, 1], [], []>} : vector<8x32xf32>, vector<32x128xf32>, vector<8x128xf32> -> vector<8x128xf32>
    %198 = vector.extract_strided_slice %195 {offsets = [0, 0], sizes = [1, 128], strides = [1, 1]} : vector<1x136xf32> to vector<1x128xf32>
    %199 = vector.broadcast %198 : vector<1x128xf32> to vector<8x128xf32>
    %200 = arith.addf %197, %199 : vector<8x128xf32>
    %201 = vector.extract_strided_slice %193 {offsets = [0, 0], sizes = [1, 128], strides = [1, 1]} : vector<4x128xf32> to vector<1x128xf32>
    %202 = vector.broadcast %201 : vector<1x128xf32> to vector<8x128xf32>
    %203 = arith.addf %200, %202 : vector<8x128xf32>
    %cst_89 = arith.constant 0.000000e+00 : f32
    %204 = vector.broadcast %cst_89 : f32 to vector<8x128xf32>
    %205 = arith.maximumf %203, %204 : vector<8x128xf32>
    %c0_90 = arith.constant 0 : index
    %c0_91 = arith.constant 0 : index
    %206 = vector.load %arg21[%c0_90, %c0_91] : memref<128x8xf32, #tpu.memory_space<vmem>>, vector<128x8xf32>
    %cst_92 = arith.constant dense<0.000000e+00> : vector<8x8xf32>
    %207 = tpu.matmul %205, %206, %cst_92 {dimension_numbers = #tpu.dot_dimension_numbers<[1], [0], [0], [1], [0, 0, 1, 1], [], []>} : vector<8x128xf32>, vector<128x8xf32>, vector<8x8xf32> -> vector<8x8xf32>
    %c0_93 = arith.constant 0 : index
    %c0_94 = arith.constant 0 : index
    %208 = vector.load %arg22[%c0_93, %c0_94] : memref<32x8xf32, #tpu.memory_space<vmem>>, vector<32x8xf32>
    %cst_95 = arith.constant dense<0.000000e+00> : vector<8x8xf32>
    %209 = tpu.matmul %192, %208, %cst_95 {dimension_numbers = #tpu.dot_dimension_numbers<[1], [0], [0], [1], [0, 0, 1, 1], [], []>} : vector<8x32xf32>, vector<32x8xf32>, vector<8x8xf32> -> vector<8x8xf32>
    %210 = arith.addf %207, %209 : vector<8x8xf32>
    %211 = vector.extract_strided_slice %195 {offsets = [0, 128], sizes = [1, 8], strides = [1, 1]} : vector<1x136xf32> to vector<1x8xf32>
    %212 = vector.broadcast %211 : vector<1x8xf32> to vector<8x8xf32>
    %213 = arith.addf %210, %212 : vector<8x8xf32>
    %214 = vector.extract_strided_slice %193 {offsets = [1, 0], sizes = [1, 8], strides = [1, 1]} : vector<4x128xf32> to vector<1x8xf32>
    %215 = vector.broadcast %214 : vector<1x8xf32> to vector<8x8xf32>
    %216 = arith.addf %213, %215 : vector<8x8xf32>
    %217 = arith.subf %216, %216 : vector<8x8xf32>
    %218 = arith.mulf %217, %217 : vector<8x8xf32>
    %cst_96 = arith.constant 9.99999974E-6 : f32
    %219 = vector.broadcast %cst_96 : f32 to vector<8x8xf32>
    %220 = arith.addf %218, %219 : vector<8x8xf32>
    %221 = math.rsqrt %220 : vector<8x8xf32>
    %222 = arith.mulf %217, %221 : vector<8x8xf32>
    %223 = vector.extract_strided_slice %193 {offsets = [2, 0], sizes = [1, 8], strides = [1, 1]} : vector<4x128xf32> to vector<1x8xf32>
    %224 = vector.broadcast %223 : vector<1x8xf32> to vector<8x8xf32>
    %225 = arith.mulf %222, %224 : vector<8x8xf32>
    %226 = vector.extract_strided_slice %193 {offsets = [3, 0], sizes = [1, 8], strides = [1, 1]} : vector<4x128xf32> to vector<1x8xf32>
    %227 = vector.broadcast %226 : vector<1x8xf32> to vector<8x8xf32>
    %228 = arith.addf %225, %227 : vector<8x8xf32>
    %229 = arith.addf %228, %75 : vector<8x8xf32>
    %230 = vector.broadcast %19 : vector<8x1xf32> to vector<8x8xf32>
    %231 = arith.mulf %229, %230 : vector<8x8xf32>
    %232 = vector.broadcast %9 : vector<8x1xf32> to vector<8x8xf32>
    %233 = arith.addf %231, %232 : vector<8x8xf32>
    %c0_97 = arith.constant 0 : index
    %c0_98 = arith.constant 0 : index
    %c0_99 = arith.constant 0 : index
    %234 = vector.load %arg25[%c0_97, %c0_98, %c0_99] : memref<1x8x8xf32, #tpu.memory_space<vmem>>, vector<1x8x8xf32>
    %235 = vector.shape_cast %234 : vector<1x8x8xf32> to vector<8x8xf32>
    %236 = vector.shape_cast %233 : vector<8x8xf32> to vector<1x8x8xf32>
    tpu.vector_store %arg25[%c0_97, %c0_98, %c0_99], %236 {strides = array<i32>} : memref<1x8x8xf32, #tpu.memory_space<vmem>>, vector<1x8x8xf32>,
    return
  }
  func.func @transform_0(%arg0: i32, %arg1: i32) -> (i32, i32, i32) {
    %c0_i32 = arith.constant 0 : i32
    %c0_i32_0 = arith.constant 0 : i32
    return %arg0, %arg1, %c0_i32 : i32, i32, i32
  }
  func.func @transform_1(%arg0: i32, %arg1: i32) -> (i32, i32, i32) {
    %c0_i32 = arith.constant 0 : i32
    %c0_i32_0 = arith.constant 0 : i32
    %c0_i32_1 = arith.constant 0 : i32
    return %arg0, %c0_i32, %c0_i32_0 : i32, i32, i32
  }
  func.func @transform_2(%arg0: i32, %arg1: i32) -> (i32, i32, i32) {
    %c0_i32 = arith.constant 0 : i32
    %c0_i32_0 = arith.constant 0 : i32
    %c0_i32_1 = arith.constant 0 : i32
    return %arg0, %c0_i32, %c0_i32_0 : i32, i32, i32
  }
  func.func @transform_3(%arg0: i32, %arg1: i32) -> (i32, i32) {
    %c0_i32 = arith.constant 0 : i32
    %c0_i32_0 = arith.constant 0 : i32
    %c0_i32_1 = arith.constant 0 : i32
    return %c0_i32, %c0_i32_0 : i32, i32
  }
  func.func @transform_4(%arg0: i32, %arg1: i32) -> (i32, i32) {
    %c0_i32 = arith.constant 0 : i32
    %c0_i32_0 = arith.constant 0 : i32
    %c0_i32_1 = arith.constant 0 : i32
    return %c0_i32, %c0_i32_0 : i32, i32
  }
  func.func @transform_5(%arg0: i32, %arg1: i32) -> (i32, i32) {
    %c0_i32 = arith.constant 0 : i32
    %c0_i32_0 = arith.constant 0 : i32
    %c0_i32_1 = arith.constant 0 : i32
    return %c0_i32, %c0_i32_0 : i32, i32
  }
  func.func @transform_6(%arg0: i32, %arg1: i32) -> (i32, i32) {
    %c0_i32 = arith.constant 0 : i32
    %c0_i32_0 = arith.constant 0 : i32
    %c0_i32_1 = arith.constant 0 : i32
    return %c0_i32, %c0_i32_0 : i32, i32
  }
  func.func @transform_7(%arg0: i32, %arg1: i32) -> (i32, i32) {
    %c0_i32 = arith.constant 0 : i32
    %c0_i32_0 = arith.constant 0 : i32
    %c0_i32_1 = arith.constant 0 : i32
    return %c0_i32, %c0_i32_0 : i32, i32
  }
  func.func @transform_8(%arg0: i32, %arg1: i32) -> (i32, i32) {
    %c0_i32 = arith.constant 0 : i32
    %c0_i32_0 = arith.constant 0 : i32
    %c0_i32_1 = arith.constant 0 : i32
    return %c0_i32, %c0_i32_0 : i32, i32
  }
  func.func @transform_9(%arg0: i32, %arg1: i32) -> (i32, i32) {
    %c0_i32 = arith.constant 0 : i32
    %c0_i32_0 = arith.constant 0 : i32
    %c0_i32_1 = arith.constant 0 : i32
    return %c0_i32, %c0_i32_0 : i32, i32
  }
  func.func @transform_10(%arg0: i32, %arg1: i32) -> (i32, i32) {
    %c0_i32 = arith.constant 0 : i32
    %c0_i32_0 = arith.constant 0 : i32
    %c0_i32_1 = arith.constant 0 : i32
    return %c0_i32, %c0_i32_0 : i32, i32
  }
  func.func @transform_11(%arg0: i32, %arg1: i32) -> (i32, i32) {
    %c0_i32 = arith.constant 0 : i32
    %c0_i32_0 = arith.constant 0 : i32
    %c0_i32_1 = arith.constant 0 : i32
    return %c0_i32, %c0_i32_0 : i32, i32
  }
  func.func @transform_12(%arg0: i32, %arg1: i32) -> (i32, i32) {
    %c0_i32 = arith.constant 0 : i32
    %c0_i32_0 = arith.constant 0 : i32
    %c0_i32_1 = arith.constant 0 : i32
    return %c0_i32, %c0_i32_0 : i32, i32
  }
  func.func @transform_13(%arg0: i32, %arg1: i32) -> (i32, i32) {
    %c0_i32 = arith.constant 0 : i32
    %c0_i32_0 = arith.constant 0 : i32
    %c0_i32_1 = arith.constant 0 : i32
    return %c0_i32, %c0_i32_0 : i32, i32
  }
  func.func @transform_14(%arg0: i32, %arg1: i32) -> (i32, i32) {
    %c0_i32 = arith.constant 0 : i32
    %c0_i32_0 = arith.constant 0 : i32
    %c0_i32_1 = arith.constant 0 : i32
    return %c0_i32, %c0_i32_0 : i32, i32
  }
  func.func @transform_15(%arg0: i32, %arg1: i32) -> (i32, i32) {
    %c0_i32 = arith.constant 0 : i32
    %c0_i32_0 = arith.constant 0 : i32
    %c0_i32_1 = arith.constant 0 : i32
    return %c0_i32, %c0_i32_0 : i32, i32
  }
  func.func @transform_16(%arg0: i32, %arg1: i32) -> (i32, i32) {
    %c0_i32 = arith.constant 0 : i32
    %c0_i32_0 = arith.constant 0 : i32
    %c0_i32_1 = arith.constant 0 : i32
    return %c0_i32, %c0_i32_0 : i32, i32
  }
  func.func @transform_17(%arg0: i32, %arg1: i32) -> (i32, i32) {
    %c0_i32 = arith.constant 0 : i32
    %c0_i32_0 = arith.constant 0 : i32
    %c0_i32_1 = arith.constant 0 : i32
    return %c0_i32, %c0_i32_0 : i32, i32
  }
  func.func @transform_18(%arg0: i32, %arg1: i32) -> (i32, i32) {
    %c0_i32 = arith.constant 0 : i32
    %c0_i32_0 = arith.constant 0 : i32
    %c0_i32_1 = arith.constant 0 : i32
    return %c0_i32, %c0_i32_0 : i32, i32
  }
  func.func @transform_19(%arg0: i32, %arg1: i32) -> (i32, i32) {
    %c0_i32 = arith.constant 0 : i32
    %c0_i32_0 = arith.constant 0 : i32
    %c0_i32_1 = arith.constant 0 : i32
    return %c0_i32, %c0_i32_0 : i32, i32
  }
  func.func @transform_20(%arg0: i32, %arg1: i32) -> (i32, i32) {
    %c0_i32 = arith.constant 0 : i32
    %c0_i32_0 = arith.constant 0 : i32
    %c0_i32_1 = arith.constant 0 : i32
    return %c0_i32, %c0_i32_0 : i32, i32
  }
  func.func @transform_21(%arg0: i32, %arg1: i32) -> (i32, i32) {
    %c0_i32 = arith.constant 0 : i32
    %c0_i32_0 = arith.constant 0 : i32
    %c0_i32_1 = arith.constant 0 : i32
    return %c0_i32, %c0_i32_0 : i32, i32
  }
  func.func @transform_22(%arg0: i32, %arg1: i32) -> (i32, i32) {
    %c0_i32 = arith.constant 0 : i32
    %c0_i32_0 = arith.constant 0 : i32
    %c0_i32_1 = arith.constant 0 : i32
    return %c0_i32, %c0_i32_0 : i32, i32
  }
  func.func @transform_23(%arg0: i32, %arg1: i32) -> (i32, i32, i32) {
    %c0_i32 = arith.constant 0 : i32
    %c0_i32_0 = arith.constant 0 : i32
    return %arg0, %arg1, %c0_i32 : i32, i32, i32
  }
}

</mosaic_0001>

<bundles_post_ra>
// kernel: tide_forward.2
= control target key start
LH: loop header
LB: loop body
LE: loop exit
PB: predicated region body
PF: predicated region fallthrough
CT: control target
= control target key end

     0   :  { %vm50_vm0 = vcmask 1043456   ;;  %vm31_vm1 = vcmask 31744   ;;  %vm133_vm2 = vcmask 261120   ;;  %v398_v63 = vmov 4.0   ;;  %s578_s1 = inlined_call_operand.vmem [shape: f32[4,32], index: 1, kind: input, shape index: {}]   ;;  %s579_s0 = inlined_call_operand.vmem [shape: f32[48,4], index: 0, kind: input, shape index: {}]   ;;  %s580_s2 = inlined_call_operand.vmem [shape: f32[36,4], index: 2, kind: input, shape index: {}]   ;;  %s581_s3 = inlined_call_operand.vmem [shape: f32[4,32], index: 3, kind: input, shape index: {}]   ;;  %s582_s4 = inlined_call_operand.vmem [shape: f32[48,4], index: 4, kind: output, shape index: {}]  }
   0x1   :  { %v23_v0 = vld [vmem:[%s578_s1] sm:$0xf]  ;;  %v22_v2 = vld [vmem:[%s579_s0 + $0x28] sm:$0xff]  ;;  %v27_v4 = vld [vmem:[%s580_s2 + $0x18] sm:$0xff]  ;;  %384 = vrcp.f32 %v398_v63 }
   0x2   :  { %v17_v1 = vld [vmem:[%s579_s0] sm:$0xff]  ;;  %357 = vmatpush.msk.msra.mxu0 %vm50_vm0, %v23_v0  ;;  %377 = vmatpush.msk.msra.mxu2 %vm50_vm0, %v23_v0  ;;  %v18_v5 = vld [vmem:[%s579_s0 + $0x8] sm:$0xff]  ;;  %v19_v6 = vld [vmem:[%s579_s0 + $0x10] sm:$0xff] }
   0x3   :  { %358 = vmatmul.msk.f32.vlgmr.msra.gmra.mxu0 %vm31_vm1, %v17_v1  ;;  %v28_v3 = vld [vmem:[%s580_s2 + $0x20] sm:$0xf]  ;;  %363 = vmatmul.msk.f32.vlgmr.msra.gmra.mxu2 %vm31_vm1, %v22_v2  ;;  %v20_v7 = vld [vmem:[%s579_s0 + $0x18] sm:$0xff]  ;;  %v26_v9 = vld [vmem:[%s580_s2 + $0x10] sm:$0xff] }
   0x4   :  { %364 = vmatpush.msk.msra.mxu1 %vm50_vm0, %v28_v3  ;;  %378 = vmatpush.msk.msrb.mxu2 %vm50_vm0, %v28_v3  ;;  %v21_v8 = vld [vmem:[%s579_s0 + $0x20] sm:$0xff]  ;;  %v25_v10 = vld [vmem:[%s580_s2 + $0x8] sm:$0xff] }
   0x5   :  { %365 = vmatmul.msk.f32.vlgmr.msra.gmra.mxu1 %vm31_vm1, %v17_v1  ;;  %379 = vmatpush.msra.mxu3 %v27_v4  ;;  %v24_v11 = vld [vmem:[%s580_s2] sm:$0xff] }
   0x6   :  { %164 = vmatpush.msra.mxu2 %v27_v4  ;;  %v475_v12 = vld [vmem:[%s581_s3] sm:$0xf] }
   0x7   :  { %380 = vmatpush.msra.mxu3 %v26_v9  ;;  %v30_v13 = vperm.slane %v475_v12, 0  ;;  %v187_v34 = vperm.slane %v475_v12, 1  ;;  %v385_v0 = vpop.eup %384 }
   0x8   :  { %165 = vmatpush.msra.mxu2 %v26_v9  ;;  %v213_v1 = vmul.f32 4.0, %v385_v0  ;;  %vm217_vm3 = vweird.f32 %v385_v0 }
   0x9   :  { %381 = vmatpush.msra.mxu3 %v25_v10 }
   0xa   :  { %166 = vmatpush.msra.mxu2 %v25_v10 }
   0xb   :  { %359 = vmatmul.msk.f32.gmra.mxu0 %vm31_vm1, %v18_v5  ;;  %370 = vmatmul.msk.f32.vlgmr.msrb.gmra.mxu2 %vm31_vm1, %v22_v2  ;;  %v214_v2 = vsub.f32 1.0, %v213_v1 }
   0xc   :  { %167 = vmatpush.msra.mxu2 %v24_v11  ;;  %382 = vmatpush.msra.mxu3 %v24_v11 }
   0xd   :  { %366 = vmatmul.msk.f32.gmra.mxu1 %vm31_vm1, %v18_v5  ;;  %v215_v3 = vmul.f32 %v385_v0, %v214_v2 }
   0xf   :  { %v216_v4 = vadd.f32 %v385_v0, %v215_v3 }
  0x11   :  { %v491_v5 = vsel %vm217_vm3, %v385_v0, %v216_v4 }
  0x13   :  { %360 = vmatmul.msk.f32.gmra.mxu0 %vm31_vm1, %v19_v6 }
  0x15   :  { %367 = vmatmul.msk.f32.gmra.mxu1 %vm31_vm1, %v19_v6 }
  0x1b   :  { %361 = vmatmul.msk.f32.gmra.mxu0 %vm31_vm1, %v20_v7 }
  0x1d   :  { %368 = vmatmul.msk.f32.gmra.mxu1 %vm31_vm1, %v20_v7 }
  0x23   :  { %362 = vmatmul.msk.f32.gmra.mxu0 %vm31_vm1, %v21_v8 }
  0x25   :  { %369 = vmatmul.msk.f32.gmra.mxu1 %vm31_vm1, %v21_v8 }
  0x80   :  { %v71_v14 = vpop.f32.mrf.mxu0 }
  0x81   :  { %v72_v15 = vadd.f32 %v71_v14, %v30_v13 }
  0x82   :  { %v115_v33 = vpop.f32.mrf.mxu1 }
  0x83   :  { %v89_v16 = vmax.f32 %v72_v15, 0.0 }
  0x85   :  { %371 = vmatmul.msk.f32.vlgmr.msra.gmra.mxu2 %vm133_vm2, %v89_v16 }
  0x86   :  { %v86_v28 = vpop.f32.mrf.mxu2 }
  0x87   :  { %v87_v30 = vadd.f32 %v86_v28, %v30_v13 }
  0x88   :  { %v74_v17 = vpop.f32.mrf.mxu0 }
  0x89   :  { %v75_v18 = vadd.f32 %v74_v17, %v30_v13  ;;  %v94_v31 = vmax.f32 %v87_v30, 0.0 }
  0x8a   :  { %v118_v36 = vpop.f32.mrf.mxu1 }
  0x8b   :  { %v90_v19 = vmax.f32 %v75_v18, 0.0 }
  0x8d   :  { %372 = vmatmul.msk.f32.gmra.mxu2 %vm133_vm2, %v90_v19 }
  0x8e   :  { %v130_v32 = vpop.f32.mrf.mxu2 }
  0x90   :  { %v77_v20 = vpop.f32.mrf.mxu0 }
  0x91   :  { %v78_v21 = vadd.f32 %v77_v20, %v30_v13 }
  0x92   :  { %v121_v42 = vpop.f32.mrf.mxu1 }
  0x93   :  { %v91_v22 = vmax.f32 %v78_v21, 0.0 }
  0x95   :  { %373 = vmatmul.msk.f32.vlgmr.msra.gmra.mxu3 %vm133_vm2, %v91_v22 }
  0x98   :  { %v80_v23 = vpop.f32.mrf.mxu0 }
  0x99   :  { %v81_v24 = vadd.f32 %v80_v23, %v30_v13 }
  0x9a   :  { %v124_v48 = vpop.f32.mrf.mxu1 }
  0x9b   :  { %v92_v25 = vmax.f32 %v81_v24, 0.0 }
  0x9d   :  { %374 = vmatmul.msk.f32.gmra.mxu3 %vm133_vm2, %v92_v25 }
  0xa0   :  { %v83_v26 = vpop.f32.mrf.mxu0 }
  0xa1   :  { %v84_v27 = vadd.f32 %v83_v26, %v30_v13 }
  0xa2   :  { %v127_v54 = vpop.f32.mrf.mxu1 }
  0xa3   :  { %v93_v29 = vmax.f32 %v84_v27, 0.0 }
  0xa5   :  { %375 = vmatmul.msk.f32.gmra.mxu3 %vm133_vm2, %v93_v29 }
  0xad   :  { %376 = vmatmul.msk.f32.gmra.mxu3 %vm133_vm2, %v94_v31 }
 0x108   :  { %v169_v35 = vpop.f32.mrf.mxu2 }
 0x109   :  { %v170_v37 = vadd.f32 %v169_v35, %v115_v33 }
 0x10b   :  { %v188_v38 = vadd.f32 %v187_v34, %v170_v37 }
 0x10d   :  { %v194_v39 = vsel %vm31_vm1, %v188_v38, 0.0 }
 0x10e   :  { %195 = vadd.xlane.f32.xlu0 %v194_v39 }
 0x110   :  { %v172_v40 = vpop.f32.mrf.mxu2 }
 0x111   :  { %v173_v41 = vadd.f32 %v172_v40, %v118_v36 }
 0x113   :  { %v189_v43 = vadd.f32 %v187_v34, %v173_v41 }
 0x115   :  { %v197_v44 = vsel %vm31_vm1, %v189_v43, 0.0 }
 0x116   :  { %198 = vadd.xlane.f32.xlu0 %v197_v44 }
 0x118   :  { %v175_v45 = vpop.f32.mrf.mxu3 }
 0x119   :  { %v176_v46 = vadd.f32 %v175_v45, %v121_v42 }
 0x11b   :  { %v190_v47 = vadd.f32 %v187_v34, %v176_v46 }
 0x11d   :  { %v200_v49 = vsel %vm31_vm1, %v190_v47, 0.0 }
 0x11e   :  { %201 = vadd.xlane.f32.xlu1 %v200_v49 }
 0x120   :  { %v178_v50 = vpop.f32.mrf.mxu3 }
 0x121   :  { %v179_v51 = vadd.f32 %v178_v50, %v124_v48 }
 0x123   :  { %v191_v52 = vadd.f32 %v187_v34, %v179_v51 }
 0x125   :  { %v203_v53 = vsel %vm31_vm1, %v191_v52, 0.0 }
 0x126   :  { %204 = vadd.xlane.f32.xlu1 %v203_v53 }
 0x128   :  { %v181_v55 = vpop.f32.mrf.mxu3 }
 0x129   :  { %v182_v56 = vadd.f32 %v181_v55, %v127_v54  ;;  %v529_v54 = vperm.slane %v475_v12, 2 }
 0x12b   :  { %v192_v57 = vadd.f32 %v187_v34, %v182_v56 }
 0x12d   :  { %v206_v58 = vsel %vm31_vm1, %v192_v57, 0.0 }
 0x12e   :  { %207 = vadd.xlane.f32.xlu2 %v206_v58 }
 0x130   :  { %v184_v59 = vpop.f32.mrf.mxu3 }
 0x131   :  { %v185_v60 = vadd.f32 %v184_v59, %v130_v32 }
 0x133   :  { %v193_v61 = vadd.f32 %v187_v34, %v185_v60 }
 0x135   :  { %v209_v62 = vsel %vm31_vm1, %v193_v61, 0.0 }
 0x136   :  { %210 = vadd.xlane.f32.xlu2 %v209_v62 }
 0x181   :  { %v196_v6 = vpop.xlane.xlu0 %195 }
 0x182   :  { %v219_v7 = vmul.f32 %v491_v5, %v196_v6 }
 0x184   :  { %v225_v8 = vsub.f32 %v188_v38, %v219_v7 }
 0x186   :  { %v231_v9 = vmul.f32 %v225_v8, %v225_v8 }
 0x188   :  { %v237_v10 = vsel %vm31_vm1, %v231_v9, 0.0 }
 0x189   :  { %238 = vadd.xlane.f32.xlu0 %v237_v10  ;;  %v199_v11 = vpop.xlane.xlu0 %198 }
 0x18a   :  { %v220_v13 = vmul.f32 %v491_v5, %v199_v11 }
 0x18c   :  { %v496_v14 = vsub.f32 %v189_v43, %v220_v13 }
 0x18e   :  { %v232_v15 = vmul.f32 %v496_v14, %v496_v14 }
 0x190   :  { %v240_v16 = vsel %vm31_vm1, %v232_v15, 0.0 }
 0x191   :  { %v202_v17 = vpop.xlane.xlu1 %201  ;;  %241 = vadd.xlane.f32.xlu1 %v240_v16 }
 0x192   :  { %v221_v18 = vmul.f32 %v491_v5, %v202_v17 }
 0x194   :  { %v502_v19 = vsub.f32 %v190_v47, %v221_v18 }
 0x196   :  { %v233_v20 = vmul.f32 %v502_v19, %v502_v19 }
 0x198   :  { %v243_v21 = vsel %vm31_vm1, %v233_v20, 0.0 }
 0x199   :  { %244 = vadd.xlane.f32.xlu2 %v243_v21  ;;  %v205_v22 = vpop.xlane.xlu1 %204 }
 0x19a   :  { %v222_v23 = vmul.f32 %v491_v5, %v205_v22 }
 0x19c   :  { %v508_v24 = vsub.f32 %v191_v52, %v222_v23 }
 0x19e   :  { %v234_v25 = vmul.f32 %v508_v24, %v508_v24 }
 0x1a0   :  { %v246_v26 = vsel %vm31_vm1, %v234_v25, 0.0 }
 0x1a1   :  { %v208_v27 = vpop.xlane.xlu2 %207  ;;  %247 = vadd.xlane.f32.xlu0 %v246_v26 }
 0x1a2   :  { %v223_v28 = vmul.f32 %v491_v5, %v208_v27 }
 0x1a4   :  { %v514_v29 = vsub.f32 %v192_v57, %v223_v28  ;;  %v532_v57 = vperm.slane %v475_v12, 3 }
 0x1a6   :  { %v235_v30 = vmul.f32 %v514_v29, %v514_v29 }
 0x1a8   :  { %v249_v31 = vsel %vm31_vm1, %v235_v30, 0.0 }
 0x1a9   :  { %v211_v32 = vpop.xlane.xlu2 %210  ;;  %250 = vadd.xlane.f32.xlu1 %v249_v31 }
 0x1aa   :  { %v224_v33 = vmul.f32 %v491_v5, %v211_v32 }
 0x1ac   :  { %v520_v34 = vsub.f32 %v193_v61, %v224_v33 }
 0x1ae   :  { %v236_v35 = vmul.f32 %v520_v34, %v520_v34 }
 0x1b0   :  { %v252_v36 = vsel %vm31_vm1, %v236_v35, 0.0 }
 0x1b1   :  { %253 = vadd.xlane.f32.xlu2 %v252_v36 }
 0x1fc   :  { %v239_v37 = vpop.xlane.xlu0 %238 }
 0x1fd   :  { %v255_v38 = vmul.f32 %v239_v37, %v491_v5 }
 0x1ff   :  { %v261_v39 = vadd.f32 1e-05, %v255_v38 }
 0x201   :  { %386 = vrsqrt.f32 %v261_v39  ;;  %vm273_vm5 = vweird.f32 %v261_v39 }
 0x204   :  { %v242_v40 = vpop.xlane.xlu1 %241 }
 0x205   :  { %v256_v41 = vmul.f32 %v242_v40, %v491_v5 }
 0x207   :  { %v387_v42 = vpop.eup %386  ;;  %v262_v43 = vadd.f32 1e-05, %v256_v41 }
 0x208   :  { %v268_v44 = vmul.f32 %v387_v42, %v261_v39  ;;  %vm274_vm4 = vweird.f32 %v387_v42 }
 0x209   :  { %388 = vrsqrt.f32 %v262_v43  ;;  %vm275_vm6 = vmor %vm273_vm5, %vm274_vm4  ;;  %vm283_vm8 = vweird.f32 %v262_v43 }
 0x20a   :  { %v269_v45 = vmul.f32 %v387_v42, %v268_v44 }
 0x20c   :  { %v270_v46 = vmul.f32 0.5, %v269_v45  ;;  %v245_v47 = vpop.xlane.xlu2 %244 }
 0x20d   :  { %v257_v48 = vmul.f32 %v245_v47, %v491_v5 }
 0x20e   :  { %v271_v49 = vsub.f32 1.5, %v270_v46 }
 0x20f   :  { %v389_v50 = vpop.eup %388  ;;  %v263_v51 = vadd.f32 1e-05, %v257_v48 }
 0x210   :  { %v272_v52 = vmul.f32 %v387_v42, %v271_v49  ;;  %v278_v53 = vmul.f32 %v389_v50, %v262_v43  ;;  %vm284_vm7 = vweird.f32 %v389_v50 }
 0x211   :  { %390 = vrsqrt.f32 %v263_v51  ;;  %vm285_vm9 = vmor %vm283_vm8, %vm284_vm7  ;;  %vm293_vm11 = vweird.f32 %v263_v51 }
 0x212   :  { %v276_v55 = vsel %vm275_vm6, %v387_v42, %v272_v52  ;;  %v279_v56 = vmul.f32 %v389_v50, %v278_v53 }
 0x213   :  { %v327_v58 = vmul.f32 %v276_v55, %v225_v8 }
 0x214   :  { %v280_v59 = vmul.f32 0.5, %v279_v56  ;;  %v248_v60 = vpop.xlane.xlu0 %247 }
 0x215   :  { %v334_v61 = vmul.f32 %v529_v54, %v327_v58  ;;  %v258_v62 = vmul.f32 %v248_v60, %v491_v5 }
 0x216   :  { %v281_v63 = vsub.f32 1.5, %v280_v59 }
 0x217   :  { %v391_v0 = vpop.eup %390  ;;  %v341_v1 = vadd.f32 %v532_v57, %v334_v61  ;;  %v264_v2 = vadd.f32 1e-05, %v258_v62 }
 0x218   :  { %v282_v3 = vmul.f32 %v389_v50, %v281_v63  ;;  %v288_v4 = vmul.f32 %v391_v0, %v263_v51  ;;  %vm294_vm10 = vweird.f32 %v391_v0 }
 0x219   :  { %347 = vst.msk [vmem:[%s582_s4] sm:$0xff] %vm31_vm1, %v341_v1  ;;  %392 = vrsqrt.f32 %v264_v2  ;;  %vm295_vm12 = vmor %vm293_vm11, %vm294_vm10  ;;  %vm303_vm14 = vweird.f32 %v264_v2 }
 0x21a   :  { %v286_v12 = vsel %vm285_vm9, %v389_v50, %v282_v3  ;;  %v289_v6 = vmul.f32 %v391_v0, %v288_v4 }
 0x21b   :  { %v328_v7 = vmul.f32 %v286_v12, %v496_v14 }
 0x21c   :  { %v290_v8 = vmul.f32 0.5, %v289_v6  ;;  %v251_v9 = vpop.xlane.xlu1 %250 }
 0x21d   :  { %v335_v10 = vmul.f32 %v529_v54, %v328_v7  ;;  %v259_v11 = vmul.f32 %v251_v9, %v491_v5 }
 0x21e   :  { %v291_v13 = vsub.f32 1.5, %v290_v8 }
 0x21f   :  { %v393_v15 = vpop.eup %392  ;;  %v342_v16 = vadd.f32 %v532_v57, %v335_v10  ;;  %v265_v17 = vadd.f32 1e-05, %v259_v11 }
 0x220   :  { %v292_v18 = vmul.f32 %v391_v0, %v291_v13  ;;  %v298_v20 = vmul.f32 %v393_v15, %v264_v2  ;;  %vm304_vm13 = vweird.f32 %v393_v15 }
 0x221   :  { %348 = vst.msk [vmem:[%s582_s4 + $0x8] sm:$0xff] %vm31_vm1, %v342_v16  ;;  %394 = vrsqrt.f32 %v265_v17  ;;  %vm305_vm15 = vmor %vm303_vm14, %vm304_vm13  ;;  %vm313_vm2 = vweird.f32 %v265_v17 }
 0x222   :  { %v296_v14 = vsel %vm295_vm12, %v391_v0, %v292_v18  ;;  %v299_v21 = vmul.f32 %v393_v15, %v298_v20 }
 0x223   :  { %v329_v22 = vmul.f32 %v296_v14, %v502_v19 }
 0x224   :  { %v300_v23 = vmul.f32 0.5, %v299_v21  ;;  %v254_v25 = vpop.xlane.xlu2 %253 }
 0x225   :  { %v336_v26 = vmul.f32 %v529_v54, %v329_v22  ;;  %v260_v27 = vmul.f32 %v254_v25, %v491_v5 }
 0x226   :  { %v301_v28 = vsub.f32 1.5, %v300_v23 }
 0x227   :  { %v395_v30 = vpop.eup %394  ;;  %v343_v31 = vadd.f32 %v532_v57, %v336_v26  ;;  %v266_v32 = vadd.f32 1e-05, %v260_v27 }
 0x228   :  { %v302_v33 = vmul.f32 %v393_v15, %v301_v28  ;;  %v308_v35 = vmul.f32 %v395_v30, %v265_v17  ;;  %vm314_vm0 = vweird.f32 %v395_v30 }
 0x229   :  { %349 = vst.msk [vmem:[%s582_s4 + $0x10] sm:$0xff] %vm31_vm1, %v343_v31  ;;  %396 = vrsqrt.f32 %v266_v32  ;;  %vm315_vm3 = vmor %vm313_vm2, %vm314_vm0  ;;  %vm323_vm5 = vweird.f32 %v266_v32 }
 0x22a   :  { %v306_v19 = vsel %vm305_vm15, %v393_v15, %v302_v33  ;;  %v309_v36 = vmul.f32 %v395_v30, %v308_v35 }
 0x22b   :  { %v330_v5 = vmul.f32 %v306_v19, %v508_v24 }
 0x22c   :  { %v310_v37 = vmul.f32 0.5, %v309_v36 }
 0x22d   :  { %v337_v38 = vmul.f32 %v529_v54, %v330_v5 }
 0x22e   :  { %v311_v39 = vsub.f32 1.5, %v310_v37 }
 0x22f   :  { %v397_v40 = vpop.eup %396  ;;  %v344_v41 = vadd.f32 %v532_v57, %v337_v38 }
 0x230   :  { %v312_v42 = vmul.f32 %v395_v30, %v311_v39  ;;  %v318_v43 = vmul.f32 %v397_v40, %v266_v32  ;;  %vm324_vm4 = vweird.f32 %v397_v40 }
 0x231   :  { %350 = vst.msk [vmem:[%s582_s4 + $0x18] sm:$0xff] %vm31_vm1, %v344_v41  ;;  %vm325_vm6 = vmor %vm323_vm5, %vm324_vm4 }
 0x232   :  { %v316_v44 = vsel %vm315_vm3, %v395_v30, %v312_v42  ;;  %v319_v45 = vmul.f32 %v397_v40, %v318_v43 }
 0x233   :  { %v331_v24 = vmul.f32 %v316_v44, %v514_v29 }
 0x234   :  { %v320_v46 = vmul.f32 0.5, %v319_v45 }
 0x235   :  { %v338_v47 = vmul.f32 %v529_v54, %v331_v24 }
 0x236   :  { %v321_v48 = vsub.f32 1.5, %v320_v46 }
 0x237   :  { %v345_v49 = vadd.f32 %v532_v57, %v338_v47 }
 0x238   :  { %v322_v50 = vmul.f32 %v397_v40, %v321_v48 }
 0x239   :  { %351 = vst.msk [vmem:[%s582_s4 + $0x20] sm:$0xff] %vm31_vm1, %v345_v49 }
 0x23a   :  { %v326_v51 = vsel %vm325_vm6, %v397_v40, %v322_v50 }
 0x23b   :  { %v332_v52 = vmul.f32 %v326_v51, %v520_v34 }
 0x23d   :  { %v339_v29 = vmul.f32 %v529_v54, %v332_v52 }
 0x23f   :  { %v346_v53 = vadd.f32 %v532_v57, %v339_v29 }
 0x241   :  { %352 = vst.msk [vmem:[%s582_s4 + $0x28] sm:$0xff] %vm31_vm1, %v346_v53 }

// kernel: tide_forward.3
= control target key start
LH: loop header
LB: loop body
LE: loop exit
PB: predicated region body
PF: predicated region fallthrough
CT: control target
= control target key end

     0   :  { %s1788_s30 = smov 0   ;;  %s1790_s24 = smov 0   ;;  %s2186_s0 = inlined_call_operand.vmem [shape: f32[2,8,16], index: 0, kind: input, shape index: {}]   ;;  %s2187_s1 = inlined_call_operand.vmem [shape: f32[2,1,96], index: 1, kind: input, shape index: {}]   ;;  %s2188_s2 = inlined_call_operand.vmem [shape: f32[2,1,32], index: 2, kind: input, shape index: {}]   ;;  %s2189_s3 = inlined_call_operand.vmem [shape: f32[16,40], index: 3, kind: input, shape index: {}]   ;;  %s2190_s4 = inlined_call_operand.vmem [shape: f32[96,64], index: 4, kind: input, shape index: {}]   ;;  %s2191_s5 = inlined_call_operand.vmem [shape: f32[32,32], index: 5, kind: input, shape index: {}]   ;;  %s2192_s6 = inlined_call_operand.vmem [shape: f32[16,32], index: 6, kind: input, shape index: {}]   ;;  %s2193_s7 = inlined_call_operand.vmem [shape: f32[4,32], index: 7, kind: input, shape index: {}]   ;;  %s2194_s8 = inlined_call_operand.vmem [shape: f32[1,8], index: 8, kind: input, shape index: {}]   ;;  %s2195_s9 = inlined_call_operand.vmem [shape: f32[32,32], index: 9, kind: input, shape index: {}]   ;;  %s2196_s10 = inlined_call_operand.vmem [shape: f32[64,32], index: 10, kind: input, shape index: {}]   ;;  %s2197_s11 = inlined_call_operand.vmem [shape: f32[4,32], index: 11, kind: input, shape index: {}]   ;;  %s2198_s12 = inlined_call_operand.vmem [shape: f32[32,32], index: 12, kind: input, shape index: {}]   ;;  %s2199_s13 = inlined_call_operand.vmem [shape: f32[64,32], index: 13, kind: input, shape index: {}]   ;;  %s2200_s14 = inlined_call_operand.vmem [shape: f32[4,32], index: 14, kind: input, shape index: {}]   ;;  %s2201_s15 = inlined_call_operand.vmem [shape: f32[32,32], index: 15, kind: input, shape index: {}]   ;;  %s2202_s16 = inlined_call_operand.vmem [shape: f32[64,32], index: 16, kind: input, shape index: {}]   ;;  %s2203_s17 = inlined_call_operand.vmem [shape: f32[4,32], index: 17, kind: input, shape index: {}]   ;;  %s2204_s18 = inlined_call_operand.vmem [shape: f32[32,128], index: 18, kind: input, shape index: {}]   ;;  %s2205_s19 = inlined_call_operand.vmem [shape: f32[128,8], index: 19, kind: input, shape index: {}]   ;;  %s2206_s20 = inlined_call_operand.vmem [shape: f32[32,8], index: 20, kind: input, shape index: {}]   ;;  %s2207_s21 = inlined_call_operand.vmem [shape: f32[32,136], index: 21, kind: input, shape index: {}]   ;;  %s2208_s22 = inlined_call_operand.vmem [shape: f32[4,128], index: 22, kind: input, shape index: {}]   ;;  %s2209_s23 = inlined_call_operand.vmem [shape: f32[2,8,8], index: 23, kind: output, shape index: {}]  }
   0x1   :  { %2218 = sst [smem:[#allocation4_spill]] %s2186_s0 }
   0x2   :  { %2219 = sst [smem:[#allocation5_spill]] %s2187_s1 }
   0x3   :  { %2220 = sst [smem:[#allocation6_spill]] %s2188_s2 }
   0x4   :  { %2221 = sst [smem:[#allocation7_spill]] %s2189_s3 }
   0x5   :  { %2222 = sst [smem:[#allocation8_spill]] %s2190_s4  ;;  %s1786_s4 = smov 0  }
   0x6   :  { %2223 = sst [smem:[#allocation9_spill]] %s2191_s5 }
   0x7   :  { %2224 = sst [smem:[#allocation10_spill]] %s2192_s6 }
   0x8   :  { %2225 = sst [smem:[#allocation11_spill]] %s2193_s7 }
   0x9   :  { %2226 = sst [smem:[#allocation12_spill]] %s2209_s23 }
   0xa LB: > { %2227 = sst [smem:[#allocation2_spill]] %s1656_s30  ;;  %s45_s25 = sadd.s32 1, %s1656_s30  ;;  %s1660_s24 = sphi %s1790_s24, %s33_s24   ;;  %s1656_s30 = sphi %s1788_s30, %s2241_s30   ;;  %s1652_s4 = sphi %s1786_s4, %s2240_s4  }
   0xb   : > { %p1571_p0 = scmp.ge.s32.totalorder %s1660_s24, 1  ;;  %p47_p1 = scmp.ge.s32.totalorder %s45_s25, 2 }
   0xc   : > { %p671_p2 = scmp.lt.s32.totalorder %s1660_s24, 3 }
   0xd   : > { %s2243_s25 = smov (%p47_p1, %s45_s25), 0 }
   0xe   : > { %2228 = sst [smem:[#allocation3_spill]] %s2243_s25  ;;  %p672_p3 = pnand %p1571_p0, %p671_p2 }
   0xf   : > { %p745_p4 = scmp.lt.s32.totalorder (!%p672_p3), %s1652_s4, 1  ;;  %s2229_s2 = sld [smem:[#allocation4_spill]] (!%p672_p3) }
  0x10   : > { %675 = sbr.rel (%p672_p3) target bundleno = 2730 (0xaaa), region = 112  ;;  %s2230_s28 = sld [smem:[#allocation8_spill]] (!%p672_p3) }
  0x11   : > { %s2231_s25 = sld [smem:[#allocation7_spill]] (!%p672_p3) }
  0x12   : > { %s2232_s30 = sld [smem:[#allocation10_spill]] (!%p672_p3) }
  0x13   : > { %s2234_s7 = sld [smem:[#allocation5_spill]] (!%p672_p3) }
  0x14   : > { %s2235_s0 = sld [smem:[#allocation9_spill]] (!%p672_p3) }
  0x15   : > { %s2245_s4 = smov (!%p745_p4, %s1652_s4), 1  ;;  %vm768_vm0 = vcmask 130048   ;;  %v1662_v2 = vmov 16.0   ;;  %vm847_vm2 = vcmask 785408   ;;  %vm903_vm8 = vcmask 261120  }
  0x16   : > { %s2214_s5 = sshll.u32 %s2245_s4, 3  ;;  %1622 = vrcp.f32 %v1662_v2  ;;  %v846_v3 = vld [vmem:[%s2230_s28 + $0x58] sm:$0xff]  ;;  %v845_v15 = vld [vmem:[%s2230_s28 + $0x50] sm:$0xff]  ;;  %v844_v16 = vld [vmem:[%s2230_s28 + $0x48] sm:$0xff]  ;;  %v1664_v2 = vmov 32.0  }
  0x17   : > { %s751_s6 = scalar_lea.vmem %s2229_s2, %s2214_s5  ;;  %855 = vmatpush.msra.mxu1 %v846_v3  ;;  %v843_v17 = vld [vmem:[%s2230_s28 + $0x40] sm:$0xff]  ;;  %v842_v18 = vld [vmem:[%s2230_s28 + $0x38] sm:$0xff]  ;;  %v841_v19 = vld [vmem:[%s2230_s28 + $0x30] sm:$0xff]  ;;  %s1663_s2 = smov 96  }
  0x18   : > { %v765_v0 = vld [vmem:[%s751_s6] sm:$0xff]  ;;  %v811_v20 = vld [vmem:[%s2231_s25 + $0x8] sm:$0xff]  ;;  %s2233_s23 = smov %s2232_s30  ;;  %v838_v26 = vld [vmem:[%s2230_s28 + $0x18] sm:$0xff]  ;;  %s2239_s6 = sld [smem:[#allocation12_spill]] }
  0x19   : > { %v769_v1 = vsel %vm768_vm0, %v765_v0, 0.0  ;;  %856 = vmatpush.msra.mxu1 %v845_v15  ;;  %829 = vmatpush.msra.mxu0 %v811_v20  ;;  %v882_v21 = vld [vmem:[%s2232_s30 + $0x8] sm:$0xff]  ;;  %v810_v23 = vld [vmem:[%s2231_s25] sm:$0xff]  ;;  %v837_v27 = vld [vmem:[%s2230_s28 + $0x10] sm:$0xff]  ;;  %s754_s29 = scalar_lea.vmem %s2234_s7, %s2245_s4  ;;  %s1665_s30 = smov 32  }
  0x1a   : > { %770 = vadd.xlane.f32.xlu0 %v769_v1  ;;  %v840_v22 = vld [vmem:[%s2230_s28 + $0x28] sm:$0xff]  ;;  %897 = vmatpush.msra.mxu2 %v882_v21  ;;  %v881_v24 = vld [vmem:[%s2233_s23] sm:$0xff]  ;;  %v880_v46 = vld [vmem:[%s2235_s0 + $0x18] sm:$0xff]  ;;  %s2236_s23 = sld [smem:[#allocation11_spill]] }
  0x1b   : > { %857 = vmatpush.msra.mxu1 %v844_v16  ;;  %830 = vmatpush.msra.mxu0 %v810_v23  ;;  %v839_v25 = vld [vmem:[%s2230_s28 + $0x20] sm:$0xff]  ;;  %v836_v28 = vld [vmem:[%s2230_s28 + $0x8] sm:$0xff]  ;;  %v879_v49 = vld [vmem:[%s2235_s0 + $0x10] sm:$0xff]  ;;  %s2237_s7 = sld [smem:[#allocation6_spill]] }
  0x1c   : > { %v1623_v4 = vpop.eup %1622  ;;  %898 = vmatpush.msra.mxu2 %v881_v24  ;;  %v835_v29 = vld [vmem:[%s2230_s28] sm:$0xff]  ;;  %v878_v50 = vld [vmem:[%s2235_s0 + $0x8] sm:$0xff]  ;;  %v977_v15 = vld [vmem:[%s2195_s9 + $0x18] sm:$0xff] }
  0x1d   : > { %v773_v5 = vmul.f32 16.0, %v1623_v4  ;;  %vm777_vm1 = vweird.f32 %v1623_v4  ;;  %858 = vmatpush.msra.mxu1 %v843_v17  ;;  %v766_v30 = vld [vmem:[%s754_s29] sm:$0x1]  ;;  %919 = vmatpush.msrb.mxu0 %v880_v46  ;;  %v985_v16 = vld [vmem:[%s2196_s10 + $0x38] sm:$0xff]  ;;  %v976_v17 = vld [vmem:[%s2195_s9 + $0x10] sm:$0xff] }
  0x1e   : > { %v877_v51 = vld [vmem:[%s2235_s0] sm:$0xff]  ;;  %1024 = vmatpush.msrb.mxu2 %v985_v16  ;;  %v983_v20 = vld [vmem:[%s2196_s10 + $0x28] sm:$0xff]  ;;  %v981_v23 = vld [vmem:[%s2196_s10 + $0x18] sm:$0xff] }
  0x1f   : > { %v774_v6 = vsub.f32 1.0, %v773_v5  ;;  %859 = vmatpush.msra.mxu1 %v842_v18  ;;  %920 = vmatpush.msrb.mxu0 %v879_v49  ;;  %v984_v18 = vld [vmem:[%s2196_s10 + $0x30] sm:$0xff]  ;;  %v974_v21 = vld [vmem:[%s2195_s9] sm:$0xff] }
  0x20   : > { %v1889_v52 = vld [vmem:[%s2236_s23] sm:$0xf]  ;;  %1025 = vmatpush.msrb.mxu2 %v984_v18  ;;  %v980_v24 = vld [vmem:[%s2196_s10 + $0x10] sm:$0xff] }
  0x21   : > { %v775_v7 = vmul.f32 %v1623_v4, %v774_v6  ;;  %860 = vmatpush.msra.mxu1 %v841_v19  ;;  %921 = vmatpush.msrb.mxu0 %v878_v50  ;;  %v874_v53 = vperm.slane %v1889_v52, 0  ;;  %v932_v61 = vperm.slane %v1889_v52, 1  ;;  %v975_v19 = vld [vmem:[%s2195_s9 + $0x8] sm:$0xff]  ;;  %s757_s29 = scalar_lea.vmem %s2237_s7, %s2245_s4 }
  0x22   : > { %1026 = vmatpush.msrb.mxu2 %v983_v20 }
  0x23   : > { %v776_v8 = vadd.f32 %v1623_v4, %v775_v7  ;;  %861 = vmatpush.msra.mxu1 %v840_v22  ;;  %922 = vmatpush.msrb.mxu0 %v877_v51  ;;  %v982_v22 = vld [vmem:[%s2196_s10 + $0x20] sm:$0xff] }
  0x24   : > { %1027 = vmatpush.msrb.mxu2 %v982_v22  ;;  %v1089_v22 = vld [vmem:[%s2199_s13 + $0x10] sm:$0xff] }
  0x25   : > { %v778_v9 = vsel %vm777_vm1, %v1623_v4, %v776_v8  ;;  %862 = vmatpush.msra.mxu1 %v839_v25 }
  0x27   : > { %863 = vmatpush.msra.mxu1 %v838_v26 }
  0x29   : > { %864 = vmatpush.msra.mxu1 %v837_v27 }
  0x2b   : > { %865 = vmatpush.msra.mxu1 %v836_v28 }
  0x2d   : > { %866 = vmatpush.msra.mxu1 %v835_v29 }
  0x2e   : > { %1575 = vmatmul.msk.f32.vlgmr.msra.gmra.mxu1 %vm847_vm2, %v766_v30 }
  0x8d   : > { %v771_v10 = vpop.xlane.xlu0 %770 }
  0x8e   : > { %v1816_v11 = vmul.f32 %v778_v9, %v771_v10 }
  0x90   : > { %v780_v12 = vsub.f32 %v765_v0, %v1816_v11 }
  0x92   : > { %v781_v13 = vmul.f32 %v780_v12, %v780_v12 }
  0x94   : > { %v782_v14 = vsel %vm768_vm0, %v781_v13, 0.0 }
  0x95   : > { %783 = vadd.xlane.f32.xlu0 %v782_v14 }
  0xab   : > { %v868_v47 = vpop.f32.mrf.mxu1 }
  0xac   : > { %v872_v48 = vperm.slane %v868_v47, 0 }
  0xae   : > { %928 = vrot.lane.b32.xlu1 %v872_v48, %s1663_s2 }
 0x108   : > { %v784_v31 = vpop.xlane.xlu0 %783 }
 0x109   : > { %v785_v32 = vmul.f32 %v784_v31, %v778_v9 }
 0x10b   : > { %v786_v33 = vadd.f32 1e-05, %v785_v32 }
 0x10d   : > { %1624 = vrsqrt.f32 %v786_v33  ;;  %vm805_vm4 = vweird.f32 %v786_v33  ;;  %vm794_vm6 = vcmp.eq.f32.partialorder %v786_v33, inf  ;;  %v797_v43 = vand.u32 2147483648, %v786_v33 }
 0x10e   : > { %vm796_vm7 = vcmp.eq.f32.partialorder %v786_v33, 0.0  ;;  %1626 = vrcp.f32 %v1664_v2  ;;  %v1083_v2 = vld [vmem:[%s2198_s12] sm:$0xff] }
 0x113   : > { %v1625_v34 = vpop.eup %1624 }
 0x114   : > { %v788_v35 = vmul.f32 %v1625_v34, %v786_v33  ;;  %vm806_vm3 = vweird.f32 %v1625_v34  ;;  %v1627_v3 = vpop.eup %1626 }
 0x115   : > { %vm807_vm5 = vmor %vm805_vm4, %vm806_vm3  ;;  %v938_v4 = vmul.f32 32.0, %v1627_v3  ;;  %vm942_vm9 = vweird.f32 %v1627_v3 }
 0x116   : > { %v789_v36 = vmul.f32 %v1625_v34, %v788_v35 }
 0x117   : > { %v939_v5 = vsub.f32 1.0, %v938_v4  ;;  %v1090_v4 = vld [vmem:[%s2199_s13 + $0x18] sm:$0xff] }
 0x118   : > { %v790_v37 = vmul.f32 0.5, %v789_v36  ;;  %v965_v36 = vperm.slane %v1889_v52, 3  ;;  %1156 = vmatpush.msra.mxu3 %v1090_v4  ;;  %v1197_v4 = vld [vmem:[%s2202_s16 + $0x8] sm:$0xff] }
 0x119   : > { %v940_v6 = vmul.f32 %v1627_v3, %v939_v5 }
 0x11a   : > { %v791_v38 = vsub.f32 1.5, %v790_v37  ;;  %1157 = vmatpush.msra.mxu3 %v1089_v22 }
 0x11b   : > { %v941_v7 = vadd.f32 %v1627_v3, %v940_v6 }
 0x11c   : > { %v792_v39 = vmul.f32 %v1625_v34, %v791_v38 }
 0x11d   : > { %v1898_v8 = vsel %vm942_vm9, %v1627_v3, %v941_v7  ;;  %v1091_v3 = vld [vmem:[%s2199_s13 + $0x20] sm:$0xff]  ;;  %vm1473_vm9 = vcmask 64512  }
 0x11e   : > { %v793_v40 = vmul.f32 %v792_v39, %v786_v33  ;;  %v808_v41 = vsel %vm807_vm5, %v1625_v34, %v792_v39  ;;  %v963_v34 = vperm.slane %v1889_v52, 2 }
 0x11f   : > { %v809_v42 = vmul.f32 %v808_v41, %v780_v12  ;;  %v978_v41 = vld [vmem:[%s2196_s10] sm:$0xff] }
 0x120   : > { %v795_v44 = vsel %vm794_vm6, %v786_v33, %v793_v40  ;;  %v929_v62 = vpop.permute.xlu1 %928  ;;  %v979_v40 = vld [vmem:[%s2196_s10 + $0x8] sm:$0xff] }
 0x121   : > { %1574 = vmatmul.msk.f32.vlgmr.msra.gmra.mxu0 %vm768_vm0, %v809_v42  ;;  %1576 = vmatmul.msk.f32.vlgmr.msra.gmra.mxu2 %vm768_vm0, %v809_v42  ;;  %v1871_v45 = vsel %vm796_vm7, %v797_v43, %v795_v44  ;;  %v986_v42 = vld [vmem:[%s2197_s11] sm:$0xf] }
 0x122   : > { %1003 = vmatpush.msra.mxu0 %v977_v15  ;;  %1047 = vmatpush.msra.mxu2 %v981_v23  ;;  %v987_v43 = vperm.slane %v986_v42, 0  ;;  %v1055_v49 = vperm.slane %v986_v42, 1  ;;  %v1079_v16 = vperm.slane %v986_v42, 2  ;;  %v1081_v18 = vperm.slane %v986_v42, 3  ;;  %v1088_v23 = vld [vmem:[%s2199_s13 + $0x8] sm:$0xff]  ;;  %v1203_v42 = vld [vmem:[%s2202_s16 + $0x38] sm:$0xff] }
 0x123   : > { %1158 = vmatpush.msra.mxu3 %v1088_v23 }
 0x124   : > { %1004 = vmatpush.msra.mxu0 %v976_v17  ;;  %1048 = vmatpush.msra.mxu2 %v980_v24  ;;  %v1087_v24 = vld [vmem:[%s2199_s13] sm:$0xff] }
 0x125   : > { %1159 = vmatpush.msra.mxu3 %v1087_v24 }
 0x126   : > { %1005 = vmatpush.msra.mxu0 %v975_v19  ;;  %1049 = vmatpush.msra.mxu2 %v979_v40 }
 0x128   : > { %1006 = vmatpush.msra.mxu0 %v974_v21  ;;  %1050 = vmatpush.msra.mxu2 %v978_v41  ;;  %v1195_v41 = vld [vmem:[%s2201_s15 + $0x18] sm:$0xff] }
 0x19e   : > { %v1892_v54 = vpop.f32.mrf.mxu0 }
 0x19f   : > { %v873_v55 = vadd.f32 %v872_v48, %v1892_v54 }
 0x1a1   : > { %v875_v56 = vadd.f32 %v874_v53, %v873_v55 }
 0x1a3   : > { %v876_v57 = vmax.f32 %v875_v56, 0.0 }
 0x1a4   : > { %v900_v58 = vpop.f32.mrf.mxu2 }
 0x1a5   : > { %1577 = vmatmul.msk.f32.vlgmr.msrb.gmra.mxu0 %vm903_vm8, %v876_v57 }
 0x222   : > { %v924_v59 = vpop.f32.mrf.mxu0 }
 0x223   : > { %v925_v60 = vadd.f32 %v924_v59, %v900_v58 }
 0x225   : > { %v931_v63 = vadd.f32 %v929_v62, %v925_v60  ;;  %v1086_v60 = vld [vmem:[%s2198_s12 + $0x18] sm:$0xff]  ;;  %v1085_v62 = vld [vmem:[%s2198_s12 + $0x10] sm:$0xff] }
 0x226   : > { %1112 = vmatpush.msrb.mxu0 %v1086_v60 }
 0x227   : > { %v933_v0 = vadd.f32 %v932_v61, %v931_v63  ;;  %v1094_v61 = vld [vmem:[%s2199_s13 + $0x38] sm:$0xff]  ;;  %v1093_v63 = vld [vmem:[%s2199_s13 + $0x30] sm:$0xff] }
 0x228   : > { %1113 = vmatpush.msrb.mxu0 %v1085_v62 }
 0x229   : > { %v934_v1 = vsel %vm903_vm8, %v933_v0, 0.0 }
 0x22a   : > { %935 = vadd.xlane.f32.xlu1 %v934_v1  ;;  %v1092_v1 = vld [vmem:[%s2199_s13 + $0x28] sm:$0xff] }
 0x29d   : > { %v936_v9 = vpop.xlane.xlu1 %935 }
 0x29e   : > { %v944_v10 = vmul.f32 %v1898_v8, %v936_v9 }
 0x2a0   : > { %v945_v12 = vsub.f32 %v933_v0, %v944_v10  ;;  %v1084_v0 = vld [vmem:[%s2198_s12 + $0x8] sm:$0xff] }
 0x2a1   : > { %1114 = vmatpush.msrb.mxu0 %v1084_v0 }
 0x2a2   : > { %v946_v13 = vmul.f32 %v945_v12, %v945_v12 }
 0x2a3   : > { %1115 = vmatpush.msrb.mxu0 %v1083_v2 }
 0x2a4   : > { %v947_v14 = vsel %vm903_vm8, %v946_v13, 0.0 }
 0x2a5   : > { %948 = vadd.xlane.f32.xlu2 %v947_v14 }
 0x318   : > { %v949_v25 = vpop.xlane.xlu2 %948 }
 0x319   : > { %v950_v26 = vmul.f32 %v949_v25, %v1898_v8  ;;  %v1095_v25 = vld [vmem:[%s2200_s14] sm:$0xf] }
 0x31a   : > { %v1188_v62 = vperm.slane %v1095_v25, 2  ;;  %v1190_v0 = vperm.slane %v1095_v25, 3 }
 0x31b   : > { %v951_v27 = vadd.f32 1e-05, %v950_v26  ;;  %v1096_v26 = vperm.slane %v1095_v25, 0 }
 0x31d   : > { %1628 = vrsqrt.f32 %v951_v27  ;;  %vm958_vm11 = vweird.f32 %v951_v27 }
 0x323   : > { %v1629_v28 = vpop.eup %1628 }
 0x324   : > { %v953_v29 = vmul.f32 %v1629_v28, %v951_v27  ;;  %vm959_vm10 = vweird.f32 %v1629_v28 }
 0x325   : > { %vm960_vm12 = vmor %vm958_vm11, %vm959_vm10 }
 0x326   : > { %v954_v30 = vmul.f32 %v1629_v28, %v953_v29 }
 0x328   : > { %v955_v31 = vmul.f32 0.5, %v954_v30  ;;  %v1164_v30 = vperm.slane %v1095_v25, 1 }
 0x32a   : > { %v956_v32 = vsub.f32 1.5, %v955_v31 }
 0x32c   : > { %v957_v33 = vmul.f32 %v1629_v28, %v956_v32 }
 0x32e   : > { %v961_v35 = vsel %vm960_vm12, %v1629_v28, %v957_v33 }
 0x32f   : > { %v962_v37 = vmul.f32 %v961_v35, %v945_v12 }
 0x331   : > { %v964_v38 = vmul.f32 %v963_v34, %v962_v37 }
 0x333   : > { %v966_v39 = vadd.f32 %v965_v36, %v964_v38 }
 0x335   : > { %1578 = vmatmul.msk.f32.vlgmr.msra.gmra.mxu0 %vm903_vm8, %v966_v39  ;;  %1579 = vmatmul.msk.f32.vlgmr.msrb.gmra.mxu2 %vm903_vm8, %v966_v39 }
 0x336   : > { %1133 = vmatpush.msrb.mxu2 %v1094_v61  ;;  %1221 = vmatpush.msra.mxu0 %v1195_v41  ;;  %v1397_v41 = vld [vmem:[%s2205_s19 + $0x68] sm:$0xff] }
 0x338   : > { %1134 = vmatpush.msrb.mxu2 %v1093_v63 }
 0x33a   : > { %1135 = vmatpush.msrb.mxu2 %v1092_v1 }
 0x33c   : > { %1136 = vmatpush.msrb.mxu2 %v1091_v3 }
 0x3b2   : > { %v1008_v44 = vpop.f32.mrf.mxu0 }
 0x3b3   : > { %v1009_v46 = vadd.f32 %v1008_v44, %v987_v43  ;;  %v1194_v43 = vld [vmem:[%s2201_s15 + $0x10] sm:$0xff] }
 0x3b4   : > { %v1202_v44 = vld [vmem:[%s2202_s16 + $0x30] sm:$0xff]  ;;  %1222 = vmatpush.msra.mxu0 %v1194_v43 }
 0x3b5   : > { %v1011_v47 = vmax.f32 %v1009_v46, 0.0  ;;  %v1193_v46 = vld [vmem:[%s2201_s15 + $0x8] sm:$0xff] }
 0x3b6   : > { %1223 = vmatpush.msra.mxu0 %v1193_v46 }
 0x3b7   : > { %1580 = vmatmul.msk.f32.vlgmr.msra.gmra.mxu2 %vm903_vm8, %v1011_v47  ;;  %v1201_v47 = vld [vmem:[%s2202_s16 + $0x28] sm:$0xff] }
 0x3b8   : > { %v1029_v48 = vpop.f32.mrf.mxu2  ;;  %1242 = vmatpush.msra.mxu2 %v1203_v42 }
 0x3ba   : > { %1243 = vmatpush.msra.mxu2 %v1202_v44  ;;  %v1396_v44 = vld [vmem:[%s2205_s19 + $0x60] sm:$0xff] }
 0x3bc   : > { %1244 = vmatpush.msra.mxu2 %v1201_v47  ;;  %v1395_v47 = vld [vmem:[%s2205_s19 + $0x58] sm:$0xff] }
 0x43a   : > { %v1052_v50 = vpop.f32.mrf.mxu2 }
 0x43b   : > { %v1053_v51 = vadd.f32 %v1052_v50, %v1029_v48  ;;  %v1192_v48 = vld [vmem:[%s2201_s15] sm:$0xff]  ;;  %v1199_v50 = vld [vmem:[%s2202_s16 + $0x18] sm:$0xff] }
 0x43c   : > { %1224 = vmatpush.msra.mxu0 %v1192_v48  ;;  %1265 = vmatpush.msrb.mxu1 %v1199_v50  ;;  %v1394_v48 = vld [vmem:[%s2205_s19 + $0x50] sm:$0xff] }
 0x43d   : > { %v1056_v52 = vadd.f32 %v1055_v49, %v1053_v51  ;;  %v1200_v49 = vld [vmem:[%s2202_s16 + $0x20] sm:$0xff]  ;;  %v1198_v51 = vld [vmem:[%s2202_s16 + $0x10] sm:$0xff] }
 0x43e   : > { %1245 = vmatpush.msra.mxu2 %v1200_v49  ;;  %1266 = vmatpush.msrb.mxu1 %v1198_v51  ;;  %v1392_v49 = vld [vmem:[%s2205_s19 + $0x40] sm:$0xff]  ;;  %v1391_v51 = vld [vmem:[%s2205_s19 + $0x38] sm:$0xff] }
 0x43f   : > { %v1057_v53 = vsel %vm903_vm8, %v1056_v52, 0.0 }
 0x440   : > { %1058 = vadd.xlane.f32.xlu2 %v1057_v53  ;;  %1267 = vmatpush.msrb.mxu1 %v1197_v4  ;;  %v1386_v4 = vld [vmem:[%s2205_s19 + $0x10] sm:$0xff] }
 0x4b3   : > { %v1059_v55 = vpop.xlane.xlu2 %1058 }
 0x4b4   : > { %v1060_v56 = vmul.f32 %v1059_v55, %v1898_v8 }
 0x4b6   : > { %v1061_v57 = vsub.f32 %v1056_v52, %v1060_v56 }
 0x4b8   : > { %v1062_v58 = vmul.f32 %v1061_v57, %v1061_v57 }
 0x4ba   : > { %v1063_v59 = vsel %vm903_vm8, %v1062_v58, 0.0 }
 0x4bb   : > { %1064 = vadd.xlane.f32.xlu0 %v1063_v59 }
 0x52e   : > { %v1065_v5 = vpop.xlane.xlu0 %1064 }
 0x52f   : > { %v1066_v6 = vmul.f32 %v1065_v5, %v1898_v8  ;;  %v1196_v5 = vld [vmem:[%s2202_s16] sm:$0xff] }
 0x530   : > { %1268 = vmatpush.msrb.mxu1 %v1196_v5  ;;  %v1385_v5 = vld [vmem:[%s2205_s19 + $0x8] sm:$0xff] }
 0x531   : > { %v1067_v7 = vadd.f32 1e-05, %v1066_v6  ;;  %v2038_v6 = vld [vmem:[%s2203_s17] sm:$0xf] }
 0x533   : > { %1630 = vrsqrt.f32 %v1067_v7  ;;  %vm1074_vm14 = vweird.f32 %v1067_v7 }
 0x539   : > { %v1631_v9 = vpop.eup %1630 }
 0x53a   : > { %v1069_v10 = vmul.f32 %v1631_v9, %v1067_v7  ;;  %vm1075_vm13 = vweird.f32 %v1631_v9  ;;  %v1205_v7 = vperm.slane %v2038_v6, 0 }
 0x53b   : > { %vm1076_vm15 = vmor %vm1074_vm14, %vm1075_vm13 }
 0x53c   : > { %v1070_v12 = vmul.f32 %v1631_v9, %v1069_v10 }
 0x53e   : > { %v1071_v13 = vmul.f32 0.5, %v1070_v12 }
 0x540   : > { %v1072_v14 = vsub.f32 1.5, %v1071_v13  ;;  %v1273_v13 = vperm.slane %v2038_v6, 1 }
 0x542   : > { %v1073_v15 = vmul.f32 %v1631_v9, %v1072_v14 }
 0x544   : > { %v1077_v17 = vsel %vm1076_vm15, %v1631_v9, %v1073_v15 }
 0x545   : > { %v1078_v19 = vmul.f32 %v1077_v17, %v1061_v57 }
 0x547   : > { %v1080_v20 = vmul.f32 %v1079_v16, %v1078_v19  ;;  %v1621_v19 = vld [vmem:[%s2194_s8] ss:$0 sm:$0xff] }
 0x549   : > { %v1082_v21 = vadd.f32 %v1081_v18, %v1080_v20 }
 0x54b   : > { %1581 = vmatmul.msk.f32.vlgmr.msrb.gmra.mxu0 %vm903_vm8, %v1082_v21  ;;  %1582 = vmatmul.msk.f32.vlgmr.msrb.gmra.mxu2 %vm903_vm8, %v1082_v21 }
 0x5c8   : > { %v1117_v27 = vpop.f32.mrf.mxu0 }
 0x5c9   : > { %v1118_v28 = vadd.f32 %v1117_v27, %v1096_v26  ;;  %v1308_v27 = vld [vmem:[%s2207_s21 + $0x30] sm:$0xff] }
 0x5ca   : > { %1325 = vmatpush.msrb.mxu3 %v1308_v27 }
 0x5cb   : > { %v1120_v29 = vmax.f32 %v1118_v28, 0.0  ;;  %v1306_v28 = vld [vmem:[%s2207_s21 + $0x20] sm:$0xff] }
 0x5cc   : > { %1326 = vmatpush.msrb.mxu3 %v1306_v28 }
 0x5cd   : > { %1583 = vmatmul.msk.f32.vlgmr.msra.gmra.mxu3 %vm903_vm8, %v1120_v29  ;;  %v1356_v29 = vld [vmem:[%s2204_s18 + $0x18] sm:$0xff] }
 0x5ce   : > { %v1138_v31 = vpop.f32.mrf.mxu2  ;;  %1373 = vmatpush.msrb.mxu2 %v1356_v29 }
 0x650   : > { %v1161_v32 = vpop.f32.mrf.mxu3 }
 0x651   : > { %v1162_v33 = vadd.f32 %v1161_v32, %v1138_v31  ;;  %v1355_v31 = vld [vmem:[%s2204_s18 + $0x10] sm:$0xff] }
 0x652   : > { %v1402_v32 = vld [vmem:[%s2206_s20 + $0x10] sm:$0xff]  ;;  %1374 = vmatpush.msrb.mxu2 %v1355_v31 }
 0x653   : > { %v1165_v34 = vadd.f32 %v1164_v30, %v1162_v33  ;;  %v1403_v30 = vld [vmem:[%s2206_s20 + $0x18] sm:$0xff]  ;;  %v1302_v33 = vld [vmem:[%s2207_s21] sm:$0xff] }
 0x654   : > { %1416 = vmatpush.msra.mxu1 %v1403_v30 }
 0x655   : > { %v1166_v35 = vsel %vm903_vm8, %v1165_v34, 0.0 }
 0x656   : > { %1167 = vadd.xlane.f32.xlu2 %v1166_v35  ;;  %1417 = vmatpush.msra.mxu1 %v1402_v32  ;;  %v1401_v35 = vld [vmem:[%s2206_s20 + $0x8] sm:$0xff] }
 0x658   : > { %1418 = vmatpush.msra.mxu1 %v1401_v35 }
 0x6c9   : > { %v1168_v36 = vpop.xlane.xlu2 %1167 }
 0x6ca   : > { %v1169_v37 = vmul.f32 %v1168_v36, %v1898_v8  ;;  %v2089_v36 = vld [vmem:[%s757_s29] sm:$0x1] }
 0x6cc   : > { %v1170_v38 = vsub.f32 %v1165_v34, %v1169_v37  ;;  %v1354_v34 = vld [vmem:[%s2204_s18 + $0x8] sm:$0xff]  ;;  %v1353_v37 = vld [vmem:[%s2204_s18] sm:$0xff] }
 0x6cd   : > { %1375 = vmatpush.msrb.mxu2 %v1354_v34 }
 0x6ce   : > { %v1171_v39 = vmul.f32 %v1170_v38, %v1170_v38 }
 0x6cf   : > { %1376 = vmatpush.msrb.mxu2 %v1353_v37 }
 0x6d0   : > { %v1172_v40 = vsel %vm903_vm8, %v1171_v39, 0.0  ;;  %v1399_v39 = vld [vmem:[%s2205_s19 + $0x78] sm:$0xff] }
 0x6d1   : > { %1173 = vadd.xlane.f32.xlu0 %v1172_v40  ;;  %v1398_v40 = vld [vmem:[%s2205_s19 + $0x70] sm:$0xff] }
 0x744   : > { %v1174_v52 = vpop.xlane.xlu0 %1173 }
 0x745   : > { %v1175_v53 = vmul.f32 %v1174_v52, %v1898_v8 }
 0x747   : > { %v1176_v55 = vadd.f32 1e-05, %v1175_v53 }
 0x749   : > { %1632 = vrsqrt.f32 %v1176_v55  ;;  %vm1183_vm1 = vweird.f32 %v1176_v55 }
 0x74f   : > { %v1633_v56 = vpop.eup %1632 }
 0x750   : > { %v1178_v57 = vmul.f32 %v1633_v56, %v1176_v55  ;;  %vm1184_vm0 = vweird.f32 %v1633_v56 }
 0x751   : > { %vm1185_vm2 = vmor %vm1183_vm1, %vm1184_vm0 }
 0x752   : > { %v1179_v58 = vmul.f32 %v1633_v56, %v1178_v57 }
 0x754   : > { %v1180_v59 = vmul.f32 0.5, %v1179_v58  ;;  %v1297_v58 = vperm.slane %v2038_v6, 2 }
 0x756   : > { %v1181_v60 = vsub.f32 1.5, %v1180_v59 }
 0x758   : > { %v1182_v61 = vmul.f32 %v1633_v56, %v1181_v60  ;;  %v1299_v60 = vperm.slane %v2038_v6, 3  ;;  %v1309_v6 = vld [vmem:[%s2207_s21 + $0x38] sm:$0xff] }
 0x759   : > { %1345 = vmatpush.msrb.mxu0 %v1309_v6 }
 0x75a   : > { %v1186_v63 = vsel %vm1185_vm2, %v1633_v56, %v1182_v61 }
 0x75b   : > { %v1187_v1 = vmul.f32 %v1186_v63, %v1170_v38  ;;  %v1400_v38 = vld [vmem:[%s2206_s20] sm:$0xff] }
 0x75c   : > { %1419 = vmatpush.msra.mxu1 %v1400_v38 }
 0x75d   : > { %v1189_v2 = vmul.f32 %v1188_v62, %v1187_v1  ;;  %v1389_v1 = vld [vmem:[%s2205_s19 + $0x28] sm:$0xff] }
 0x75f   : > { %v1191_v3 = vadd.f32 %v1190_v0, %v1189_v2  ;;  %v1390_v0 = vld [vmem:[%s2205_s19 + $0x30] sm:$0xff]  ;;  %v1388_v2 = vld [vmem:[%s2205_s19 + $0x20] sm:$0xff] }
 0x761   : > { %1584 = vmatmul.msk.f32.vlgmr.msra.gmra.mxu0 %vm903_vm8, %v1191_v3  ;;  %1585 = vmatmul.msk.f32.vlgmr.msra.gmra.mxu2 %vm903_vm8, %v1191_v3  ;;  %v1387_v3 = vld [vmem:[%s2205_s19 + $0x18] sm:$0xff] }
 0x7de   : > { %v1226_v9 = vpop.f32.mrf.mxu0 }
 0x7df   : > { %v1227_v10 = vadd.f32 %v1226_v9, %v1205_v7  ;;  %v1384_v7 = vld [vmem:[%s2205_s19] sm:$0xff]  ;;  %v1307_v9 = vld [vmem:[%s2207_s21 + $0x28] sm:$0xff] }
 0x7e0   : > { %1346 = vmatpush.msrb.mxu0 %v1307_v9 }
 0x7e1   : > { %v1229_v12 = vmax.f32 %v1227_v10, 0.0  ;;  %v1305_v10 = vld [vmem:[%s2207_s21 + $0x18] sm:$0xff] }
 0x7e2   : > { %1347 = vmatpush.msrb.mxu0 %v1305_v10 }
 0x7e3   : > { %1586 = vmatmul.msk.f32.vlgmr.msrb.gmra.mxu1 %vm903_vm8, %v1229_v12  ;;  %v1303_v12 = vld [vmem:[%s2207_s21 + $0x8] sm:$0xff] }
 0x7e4   : > { %v1247_v14 = vpop.f32.mrf.mxu2  ;;  %1348 = vmatpush.msrb.mxu0 %v1303_v12 }
 0x7e5   : > { %1588 = vmatmul.msk.f32.vlgmr.msrb.gmra.mxu0 %vm903_vm8, %v2089_v36 }
 0x860   : > { %v1270_v15 = vpop.f32.mrf.mxu1 }
 0x861   : > { %v1271_v16 = vadd.f32 %v1270_v15, %v1247_v14  ;;  %v1301_v14 = vld [vmem:[%s2208_s22] sm:$0xf] }
 0x862   : > { %v1462_v37 = vperm.slane %v1301_v14, 2 }
 0x863   : > { %v1274_v17 = vadd.f32 %v1273_v13, %v1271_v16  ;;  %v1381_v16 = vperm.slane %v1301_v14, 0 }
 0x865   : > { %v1275_v18 = vsel %vm903_vm8, %v1274_v17, 0.0 }
 0x866   : > { %1276 = vadd.xlane.f32.xlu2 %v1275_v18 }
 0x87e   : > { %970 = vrot.lane.b32.xlu2 %v1621_v19, %s1665_s30  ;;  %s2238_s30 = sshll.u32 %s2245_s4, 3 }
 0x87f   : > { %s764_s27 = scalar_lea.vmem %s2239_s6, %s2238_s30 }
 0x8d9   : > { %v1277_v20 = vpop.xlane.xlu2 %1276 }
 0x8da   : > { %v1278_v21 = vmul.f32 %v1277_v20, %v1898_v8 }
 0x8dc   : > { %v2048_v22 = vsub.f32 %v1274_v17, %v1278_v21  ;;  %v1350_v21 = vpop.f32.mrf.mxu0 }
 0x8de   : > { %v1280_v23 = vmul.f32 %v2048_v22, %v2048_v22 }
 0x8e0   : > { %v1281_v24 = vsel %vm903_vm8, %v1280_v23, 0.0 }
 0x8e1   : > { %1282 = vadd.xlane.f32.xlu0 %v1281_v24  ;;  %v971_v25 = vpop.permute.xlu2 %970 }
 0x8e2   : > { %v973_v26 = vadd.f32 %v971_v25, %v1892_v54  ;;  %v1304_v54 = vld [vmem:[%s2207_s21 + $0x10] sm:$0xff] }
 0x8e3   : > { %1327 = vmatpush.msrb.mxu3 %v1304_v54 }
 0x8e5   : > { %1328 = vmatpush.msrb.mxu3 %v1302_v33 }
 0x8e6   : > { %1587 = vmatmul.msk.f32.vlgmr.msrb.gmra.mxu3 %vm903_vm8, %v2089_v36 }
 0x8e7   : > { %1424 = vmatpush.msra.mxu3 %v1399_v39  ;;  %v1464_v39 = vperm.slane %v1301_v14, 3 }
 0x8e9   : > { %1425 = vmatpush.msra.mxu3 %v1398_v40 }
 0x8eb   : > { %1426 = vmatpush.msra.mxu3 %v1397_v41 }
 0x8ed   : > { %1427 = vmatpush.msra.mxu3 %v1396_v44 }
 0x8ef   : > { %1428 = vmatpush.msra.mxu3 %v1395_v47 }
 0x8f1   : > { %1429 = vmatpush.msra.mxu3 %v1394_v48 }
 0x8f5   : > { %1467 = vrot.lane.b32.xlu0 %v973_v26, %s1663_s2  ;;  %v1446_v26 = vperm.slane %v1301_v14, 1 }
 0x954   : > { %v1283_v42 = vpop.xlane.xlu0 %1282 }
 0x955   : > { %v1284_v43 = vmul.f32 %v1283_v42, %v1898_v8  ;;  %v1393_v8 = vld [vmem:[%s2205_s19 + $0x48] sm:$0xff] }
 0x956   : > { %1430 = vmatpush.msra.mxu3 %v1393_v8 }
 0x957   : > { %v1285_v46 = vadd.f32 1e-05, %v1284_v43 }
 0x958   : > { %1431 = vmatpush.msra.mxu3 %v1392_v49 }
 0x959   : > { %1634 = vrsqrt.f32 %v1285_v46  ;;  %vm1292_vm4 = vweird.f32 %v1285_v46 }
 0x95a   : > { %1432 = vmatpush.msra.mxu3 %v1391_v51 }
 0x95c   : > { %1433 = vmatpush.msra.mxu3 %v1390_v0 }
 0x95e   : > { %1434 = vmatpush.msra.mxu3 %v1389_v1 }
 0x95f   : > { %v1635_v50 = vpop.eup %1634 }
 0x960   : > { %v1287_v52 = vmul.f32 %v1635_v50, %v1285_v46  ;;  %vm1293_vm3 = vweird.f32 %v1635_v50  ;;  %1435 = vmatpush.msra.mxu3 %v1388_v2 }
 0x961   : > { %vm1294_vm5 = vmor %vm1292_vm4, %vm1293_vm3 }
 0x962   : > { %v1288_v53 = vmul.f32 %v1635_v50, %v1287_v52  ;;  %1436 = vmatpush.msra.mxu3 %v1387_v3 }
 0x964   : > { %v1289_v55 = vmul.f32 0.5, %v1288_v53  ;;  %1437 = vmatpush.msra.mxu3 %v1386_v4 }
 0x966   : > { %v1290_v56 = vsub.f32 1.5, %v1289_v55  ;;  %1438 = vmatpush.msra.mxu3 %v1385_v5 }
 0x967   : > { %v1468_v43 = vpop.permute.xlu0 %1467 }
 0x968   : > { %v1291_v57 = vmul.f32 %v1635_v50, %v1290_v56  ;;  %1439 = vmatpush.msra.mxu3 %v1384_v7 }
 0x969   : > { %v1330_v13 = vpop.f32.mrf.mxu3 }
 0x96a   : > { %v1295_v59 = vsel %vm1294_vm5, %v1635_v50, %v1291_v57  ;;  %v1357_v15 = vperm.slane %v1330_v13, 0 }
 0x96b   : > { %v1296_v61 = vmul.f32 %v1295_v59, %v2048_v22  ;;  %v1444_v22 = vperm.slane %v1350_v21, 0 }
 0x96d   : > { %v1298_v62 = vmul.f32 %v1297_v58, %v1296_v61 }
 0x96f   : > { %v1300_v63 = vadd.f32 %v1299_v60, %v1298_v62 }
 0x971   : > { %1589 = vmatmul.msk.f32.vlgmr.msrb.gmra.mxu2 %vm903_vm8, %v1300_v63  ;;  %1590 = vmatmul.msk.f32.vlgmr.msra.gmra.mxu1 %vm903_vm8, %v1300_v63 }
 0x9ee   : > { %v1421_v23 = vpop.f32.mrf.mxu1 }
 0x9f4   : > { %v1378_v17 = vpop.f32.mrf.mxu2 }
 0x9f5   : > { %v1379_v18 = vadd.f32 %v1378_v17, %v1357_v15 }
 0x9f7   : > { %v1382_v19 = vadd.f32 %v1381_v16, %v1379_v18 }
 0x9f9   : > { %v1383_v20 = vmax.f32 %v1382_v19, 0.0 }
 0x9fb   : > { %1440 = vmatmul.f32.vlgmr.msra.gmra.mxu3 %v1383_v20 }
 0xa7e   : > { %v1441_v24 = vpop.f32.mrf.mxu3 }
 0xa7f   : > { %v1442_v25 = vadd.f32 %v1441_v24, %v1421_v23 }
 0xa81   : > { %v1445_v27 = vadd.f32 %v1444_v22, %v1442_v25 }
 0xa83   : > { %v1447_v28 = vadd.f32 %v1446_v26, %v1445_v27 }
 0xa85   : > { %v1448_v29 = vsub.f32 %v1447_v28, %v1447_v28 }
 0xa87   : > { %v1449_v30 = vmul.f32 %v1448_v29, %v1448_v29 }
 0xa89   : > { %v1450_v54 = vadd.f32 1e-05, %v1449_v30 }
 0xa8b   : > { %1636 = vrsqrt.f32 %v1450_v54  ;;  %vm1457_vm7 = vweird.f32 %v1450_v54 }
 0xa91   : > { %v1637_v31 = vpop.eup %1636 }
 0xa92   : > { %v1452_v32 = vmul.f32 %v1637_v31, %v1450_v54  ;;  %vm1458_vm6 = vweird.f32 %v1637_v31 }
 0xa93   : > { %vm1459_vm8 = vmor %vm1457_vm7, %vm1458_vm6 }
 0xa94   : > { %v1453_v33 = vmul.f32 %v1637_v31, %v1452_v32 }
 0xa96   : > { %v1454_v34 = vmul.f32 0.5, %v1453_v33 }
 0xa98   : > { %v1455_v35 = vsub.f32 1.5, %v1454_v34 }
 0xa9a   : > { %v1456_v36 = vmul.f32 %v1637_v31, %v1455_v35 }
 0xa9c   : > { %v1460_v38 = vsel %vm1459_vm8, %v1637_v31, %v1456_v36 }
 0xa9d   : > { %v1461_v40 = vmul.f32 %v1460_v38, %v1448_v29 }
 0xa9f   : > { %v1463_v41 = vmul.f32 %v1462_v37, %v1461_v40 }
 0xaa1   : > { %v1465_v42 = vadd.f32 %v1464_v39, %v1463_v41 }
 0xaa3   : > { %v1470_v44 = vadd.f32 %v1468_v43, %v1465_v42 }
 0xaa5   : > { %v1471_v46 = vmul.f32 %v1470_v44, %v1871_v45 }
 0xaa7   : > { %v1472_v47 = vadd.f32 %v1471_v46, %v1816_v11 }
 0xaa9   : > { %1474 = vst.msk [vmem:[%s764_s27] sm:$0xff] %vm1473_vm9, %v1472_v47 }
 0xaaa PF: > { %s33_s24 = sadd.s32 1, %s1660_s24   ;;  %s2240_s4 = sld [smem:[#allocation2_spill]] }
 0xaab   : > { %p30_p5 = scmp.ge.s32.totalorder %s33_s24, 4   ;;  %s2241_s30 = sld [smem:[#allocation3_spill]] }
 0xaad   :  { %32 = sbr.rel (!%p30_p5) target bundleno = 10 (0xa), region = 148 }

</bundles_post_ra>
